<compile_context>
chip_gen: v7x
topology: tpu7x:2x2x1
jax: 0.10.0
libtpu: 0.0.40
codegen_flags: <defaults>
</compile_context>

<pallas_src>
import functools

import jax
import jax.numpy as jnp
from jax.experimental import pallas as pl
from jax.experimental.pallas import tpu as pltpu


# ----------------------------- Pallas kernel ------------------------------- #
def _ae_conv_kernel(x_ref,
                    w1_ref, b1_ref,
                    w2_ref, b2_ref,
                    w3_ref, b3_ref,
                    w4_ref, b4_ref,
                    o_ref):
    """All four conv layers fused; everything resident in VMEM.

    x_ref  : (Bb, C_in*L)       batch tile on sublanes, (channel,length) on lanes
    wK_ref : (C_in*L, C_out*L)  bf16 structured conv-as-matmul weight
    bK_ref : (1, C_out*L)       f32 bias, already repeated per length position
    o_ref  : (Bb, D*L)          f32 output tile
    """
    def layer(h, w_ref, b_ref):
        # One MXU matmul per layer: taps, channel mixing and the zero-padding
        # boundary are all folded into the weight.  bf16 operands, f32 acc.
        y = jnp.dot(h.astype(jnp.bfloat16), w_ref[...],
                    preferred_element_type=jnp.float32)
        return jnp.maximum(y + b_ref[...], 0.0)

    h = layer(x_ref[...], w1_ref, b1_ref)   # conv1
    h = layer(h, w2_ref, b2_ref)            # conv2
    h = layer(h, w3_ref, b3_ref)            # t_conv1 (as conv)
    h = layer(h, w4_ref, b4_ref)            # t_conv2 (as conv)
    o_ref[...] = h


# ------------------------ one-time weight preparation ----------------------- #
def _expand_conv_weight(w_eq, L):
    """Conv-equivalent weight (C_out, C_in, 3) -> (C_in*L, C_out*L) bf16.

    W_hat[c*L + l_in, o*L + l_out] = w_eq[o, c, l_in - l_out + 1] when
    |l_in - l_out| <= 1, else 0.  This realizes 'Conv1d K=3 pad=1' as a single
    dense matmul on the flattened (channel, length) lane layout; the zero
    padding at l = -1 / L is simply the absence of those entries."""
    c_out, c_in, k = w_eq.shape
    diff = jnp.arange(L)[:, None] - jnp.arange(L)[None, :] + 1     # l_in - l_out + 1
    valid = ((diff >= 0) & (diff <= k - 1)).astype(jnp.float32)    # (L, L)
    tap = jnp.clip(diff, 0, k - 1)                                 # (L, L)
    w_ic = jnp.transpose(w_eq, (1, 0, 2)).astype(jnp.float32)      # (C_in, C_out, K)
    big = jnp.take(w_ic, tap, axis=2)                              # (C_in, C_out, L, L)
    big = big * valid[None, None, :, :]
    big = jnp.transpose(big, (0, 2, 1, 3))                         # (C_in, L_in, C_out, L_out)
    return big.reshape(c_in * L, c_out * L).astype(jnp.bfloat16)


def _tconv_as_conv(w):
    """PyTorch ConvTranspose1d weight (C_in, C_out, 3), stride=1 pad=1, is a
    Conv1d with channel axes swapped and the kernel flipped along K."""
    return jnp.flip(jnp.transpose(w, (1, 0, 2)), axis=2)           # (C_out, C_in, K)


def prepare_params(torch_params, data_size):
    """PyTorch layout -> kernel layout; done once at parameter-load time."""
    L = data_size
    w1, b1, w2, b2, wt1, bt1, wt2, bt2 = torch_params

    def bias_row(b):
        # bias[o] lands at lane o*L + l for every l -> repeat each element L times.
        return jnp.repeat(b.astype(jnp.float32), L)[None, :]

    return (
        _expand_conv_weight(w1, L),               bias_row(b1),
        _expand_conv_weight(w2, L),               bias_row(b2),
        _expand_conv_weight(_tconv_as_conv(wt1), L), bias_row(bt1),
        _expand_conv_weight(_tconv_as_conv(wt2), L), bias_row(bt2),
    )


# ------------------------------ JAX wrapper -------------------------------- #
@functools.partial(jax.jit, static_argnames=("data_size", "block_batch_cap"))
def autoencoder_conv_forward(x_flat, kernel_params, *, data_size,
                             block_batch_cap=256):
    """Batched conv-branch forward.

    x_flat : (B, data_size*data_size) -- each row is one sample's flattened
             input (the PyTorch module processes one such row per call and
             returns (1, D, D)).
    Returns (B, data_size, data_size), float32.
    """
    d = data_size
    feat = d * d
    b = x_flat.shape[0]

    # Batch tiling: multiple of 8 (sublane granularity); keep >=2 grid steps
    # when the batch allows so ("parallel",) can use both TCs on v7x.
    b8 = -(-b // 8) * 8
    if b8 >= 16:
        bb = max(8, min(block_batch_cap, (b8 // 2) // 8 * 8))
    else:
        bb = b8
    b_pad = -(-b8 // bb) * bb
    grid = (b_pad // bb,)

    x2 = x_flat.reshape(b, feat).astype(jnp.float32)
    if b_pad != b:
        x2 = jnp.pad(x2, ((0, b_pad - b), (0, 0)))

    def full_spec(p):
        return pl.BlockSpec(p.shape, lambda i: (0, 0))

    in_specs = [pl.BlockSpec((bb, feat), lambda i: (i, 0))]
    in_specs += [full_spec(p) for p in kernel_params]

    out = pl.pallas_call(
        _ae_conv_kernel,
        out_shape=jax.ShapeDtypeStruct((b_pad, feat), jnp.float32),
        grid=grid,
        in_specs=in_specs,
        out_specs=pl.BlockSpec((bb, feat), lambda i: (i, 0)),
        compiler_params=pltpu.CompilerParams(
            dimension_semantics=("parallel",)),
    )(x2, *kernel_params)

    # Pure reshape (no transpose) back to the module's (B, D, D) output shape.
    return out[:b].reshape(b, d, d)


# ------------------------------ Reference ---------------------------------- #
def _conv1d_ref(x, w, b):
    """x: (C_in, L), w: (C_out, C_in, 3) PyTorch Conv1d layout, pad=1."""
    L = x.shape[1]
    xp = jnp.pad(x, ((0, 0), (1, 1)))
    patches = jnp.stack([xp[:, k:k + L] for k in range(3)], axis=-1)  # (Ci,L,K)
    return jnp.einsum('oik,ilk->ol', w, patches) + b[:, None]


def _tconv1d_ref(x, w, b):
    """x: (C_in, L), w: (C_in, C_out, 3) PyTorch ConvTranspose1d, stride=1 pad=1."""
    L = x.shape[1]
    xp = jnp.pad(x, ((0, 0), (1, 1)))
    patches = jnp.stack([xp[:, k:k + L] for k in range(3)], axis=-1)  # (Ci,L,K)
    wflip = jnp.flip(w, axis=2)
    return jnp.einsum('iok,ilk->ol', wflip, patches) + b[:, None]


def _reference_forward_single(x_flat, torch_params, data_size):
    x = x_flat.reshape(data_size, data_size).astype(jnp.float32)
    w1, b1, w2, b2, wt1, bt1, wt2, bt2 = torch_params
    h = jnp.maximum(_conv1d_ref(x, w1, b1), 0.0)
    h = jnp.maximum(_conv1d_ref(h, w2, b2), 0.0)
    h = jnp.maximum(_tconv1d_ref(h, wt1, bt1), 0.0)
    h = jnp.maximum(_tconv1d_ref(h, wt2, bt2), 0.0)
    return h


# --------------------------------- Main ------------------------------------ #
if __name__ == "__main__":
    DATA_SIZE = 16   # dataSize; conv branch sees each sample as (1, D, D)
    BATCH = 64       # samples; tiled (bb=32) -> 2 grid steps (both TCs on v7x)

    key = jax.random.PRNGKey(0)
    keys = jax.random.split(key, 9)

    # Deterministic parameter init (shapes follow nn.Conv1d / nn.ConvTranspose1d)
    w1 = 0.1 * jax.random.normal(keys[0], (16, DATA_SIZE, 3), jnp.float32)
    b1 = 0.1 * jax.random.normal(keys[1], (16,), jnp.float32)
    w2 = 0.1 * jax.random.normal(keys[2], (32, 16, 3), jnp.float32)
    b2 = 0.1 * jax.random.normal(keys[3], (32,), jnp.float32)
    wt1 = 0.1 * jax.random.normal(keys[4], (32, 16, 3), jnp.float32)   # (C_in, C_out, K)
    bt1 = 0.1 * jax.random.normal(keys[5], (16,), jnp.float32)
    wt2 = 0.1 * jax.random.normal(keys[6], (16, DATA_SIZE, 3), jnp.float32)
    bt2 = 0.1 * jax.random.normal(keys[7], (DATA_SIZE,), jnp.float32)
    torch_params = (w1, b1, w2, b2, wt1, bt1, wt2, bt2)

    # One-time conversion to kernel layout (not part of the per-call path).
    kernel_params = prepare_params(torch_params, DATA_SIZE)

    x_flat = jax.random.normal(keys[8], (BATCH, DATA_SIZE * DATA_SIZE), jnp.float32)

    out = autoencoder_conv_forward(x_flat, kernel_params, data_size=DATA_SIZE)
    out = jax.block_until_ready(out)

    ref = jax.vmap(
        lambda xf: _reference_forward_single(xf, torch_params, DATA_SIZE))(x_flat)

    assert out.shape == (BATCH, DATA_SIZE, DATA_SIZE)
    # bf16 MXU operands with f32 accumulation -> relaxed tolerance vs f32 ref.
    assert jnp.allclose(out, ref, rtol=3e-2, atol=3e-2), "mismatch vs reference"

    # TODO(synk): other AutoEncoder branches (baseline MLP, LSTM/GRU, VAE, conv2D)
    # are not exercised here; only the conv (Conv1d autoencoder) branch is implemented.
    print("KERNEL_OK")
</pallas_src>

<mosaic_0001>
module attributes {stable_mosaic.version = 11 : i64} {
  func.func @_ae_conv_kernel(%arg0: i32, %arg1: memref<32x256xf32, #tpu.memory_space<vmem>>, %arg2: memref<256x256xbf16, #tpu.memory_space<vmem>>, %arg3: memref<1x256xf32, #tpu.memory_space<vmem>>, %arg4: memref<256x512xbf16, #tpu.memory_space<vmem>>, %arg5: memref<1x512xf32, #tpu.memory_space<vmem>>, %arg6: memref<512x256xbf16, #tpu.memory_space<vmem>>, %arg7: memref<1x256xf32, #tpu.memory_space<vmem>>, %arg8: memref<256x256xbf16, #tpu.memory_space<vmem>>, %arg9: memref<1x256xf32, #tpu.memory_space<vmem>>, %arg10: memref<32x256xf32, #tpu.memory_space<vmem>>) attributes {dimension_semantics = [#tpu.dimension_semantics<parallel>], iteration_bounds = array<i64: 2>, scalar_prefetch = 0 : i64, scratch_operands = 0 : i64, tpu.core_type = #tpu.core_type<tc>, window_params = [{transform_indices = @transform_0, window_bounds = array<i64: 32, 256>}, {pipeline_mode = #tpu.pipeline_mode<synchronous>, transform_indices = @transform_1, window_bounds = array<i64: 256, 256>}, {pipeline_mode = #tpu.pipeline_mode<synchronous>, transform_indices = @transform_2, window_bounds = array<i64: 1, 256>}, {pipeline_mode = #tpu.pipeline_mode<synchronous>, transform_indices = @transform_3, window_bounds = array<i64: 256, 512>}, {pipeline_mode = #tpu.pipeline_mode<synchronous>, transform_indices = @transform_4, window_bounds = array<i64: 1, 512>}, {pipeline_mode = #tpu.pipeline_mode<synchronous>, transform_indices = @transform_5, window_bounds = array<i64: 512, 256>}, {pipeline_mode = #tpu.pipeline_mode<synchronous>, transform_indices = @transform_6, window_bounds = array<i64: 1, 256>}, {pipeline_mode = #tpu.pipeline_mode<synchronous>, transform_indices = @transform_7, window_bounds = array<i64: 256, 256>}, {pipeline_mode = #tpu.pipeline_mode<synchronous>, transform_indices = @transform_8, window_bounds = array<i64: 1, 256>}, {transform_indices = @transform_9, window_bounds = array<i64: 32, 256>}]} {
    %c0 = arith.constant 0 : index
    %c0_0 = arith.constant 0 : index
    %0 = vector.load %arg1[%c0, %c0_0] : memref<32x256xf32, #tpu.memory_space<vmem>>, vector<32x256xf32>
    %1 = arith.truncf %0 : vector<32x256xf32> to vector<32x256xbf16>
    %c0_1 = arith.constant 0 : index
    %c0_2 = arith.constant 0 : index
    %2 = vector.load %arg2[%c0_1, %c0_2] : memref<256x256xbf16, #tpu.memory_space<vmem>>, vector<256x256xbf16>
    %cst = arith.constant dense<0.000000e+00> : vector<32x256xf32>
    %3 = tpu.matmul %1, %2, %cst {dimension_numbers = #tpu.dot_dimension_numbers<[1], [0], [0], [1], [0, 0, 1, 1], [], []>} : vector<32x256xbf16>, vector<256x256xbf16>, vector<32x256xf32> -> vector<32x256xf32>
    %c0_3 = arith.constant 0 : index
    %c0_4 = arith.constant 0 : index
    %4 = vector.load %arg3[%c0_3, %c0_4] : memref<1x256xf32, #tpu.memory_space<vmem>>, vector<1x256xf32>
    %5 = vector.broadcast %4 : vector<1x256xf32> to vector<32x256xf32>
    %6 = arith.addf %3, %5 : vector<32x256xf32>
    %cst_5 = arith.constant 0.000000e+00 : f32
    %7 = vector.broadcast %cst_5 : f32 to vector<32x256xf32>
    %8 = arith.maximumf %6, %7 : vector<32x256xf32>
    %9 = arith.truncf %8 : vector<32x256xf32> to vector<32x256xbf16>
    %c0_6 = arith.constant 0 : index
    %c0_7 = arith.constant 0 : index
    %10 = vector.load %arg4[%c0_6, %c0_7] : memref<256x512xbf16, #tpu.memory_space<vmem>>, vector<256x512xbf16>
    %cst_8 = arith.constant dense<0.000000e+00> : vector<32x512xf32>
    %11 = tpu.matmul %9, %10, %cst_8 {dimension_numbers = #tpu.dot_dimension_numbers<[1], [0], [0], [1], [0, 0, 1, 1], [], []>} : vector<32x256xbf16>, vector<256x512xbf16>, vector<32x512xf32> -> vector<32x512xf32>
    %c0_9 = arith.constant 0 : index
    %c0_10 = arith.constant 0 : index
    %12 = vector.load %arg5[%c0_9, %c0_10] : memref<1x512xf32, #tpu.memory_space<vmem>>, vector<1x512xf32>
    %13 = vector.broadcast %12 : vector<1x512xf32> to vector<32x512xf32>
    %14 = arith.addf %11, %13 : vector<32x512xf32>
    %cst_11 = arith.constant 0.000000e+00 : f32
    %15 = vector.broadcast %cst_11 : f32 to vector<32x512xf32>
    %16 = arith.maximumf %14, %15 : vector<32x512xf32>
    %17 = arith.truncf %16 : vector<32x512xf32> to vector<32x512xbf16>
    %c0_12 = arith.constant 0 : index
    %c0_13 = arith.constant 0 : index
    %18 = vector.load %arg6[%c0_12, %c0_13] : memref<512x256xbf16, #tpu.memory_space<vmem>>, vector<512x256xbf16>
    %cst_14 = arith.constant dense<0.000000e+00> : vector<32x256xf32>
    %19 = tpu.matmul %17, %18, %cst_14 {dimension_numbers = #tpu.dot_dimension_numbers<[1], [0], [0], [1], [0, 0, 1, 1], [], []>} : vector<32x512xbf16>, vector<512x256xbf16>, vector<32x256xf32> -> vector<32x256xf32>
    %c0_15 = arith.constant 0 : index
    %c0_16 = arith.constant 0 : index
    %20 = vector.load %arg7[%c0_15, %c0_16] : memref<1x256xf32, #tpu.memory_space<vmem>>, vector<1x256xf32>
    %21 = vector.broadcast %20 : vector<1x256xf32> to vector<32x256xf32>
    %22 = arith.addf %19, %21 : vector<32x256xf32>
    %cst_17 = arith.constant 0.000000e+00 : f32
    %23 = vector.broadcast %cst_17 : f32 to vector<32x256xf32>
    %24 = arith.maximumf %22, %23 : vector<32x256xf32>
    %25 = arith.truncf %24 : vector<32x256xf32> to vector<32x256xbf16>
    %c0_18 = arith.constant 0 : index
    %c0_19 = arith.constant 0 : index
    %26 = vector.load %arg8[%c0_18, %c0_19] : memref<256x256xbf16, #tpu.memory_space<vmem>>, vector<256x256xbf16>
    %cst_20 = arith.constant dense<0.000000e+00> : vector<32x256xf32>
    %27 = tpu.matmul %25, %26, %cst_20 {dimension_numbers = #tpu.dot_dimension_numbers<[1], [0], [0], [1], [0, 0, 1, 1], [], []>} : vector<32x256xbf16>, vector<256x256xbf16>, vector<32x256xf32> -> vector<32x256xf32>
    %c0_21 = arith.constant 0 : index
    %c0_22 = arith.constant 0 : index
    %28 = vector.load %arg9[%c0_21, %c0_22] : memref<1x256xf32, #tpu.memory_space<vmem>>, vector<1x256xf32>
    %29 = vector.broadcast %28 : vector<1x256xf32> to vector<32x256xf32>
    %30 = arith.addf %27, %29 : vector<32x256xf32>
    %cst_23 = arith.constant 0.000000e+00 : f32
    %31 = vector.broadcast %cst_23 : f32 to vector<32x256xf32>
    %32 = arith.maximumf %30, %31 : vector<32x256xf32>
    %c0_24 = arith.constant 0 : index
    %c0_25 = arith.constant 0 : index
    %33 = vector.load %arg10[%c0_24, %c0_25] : memref<32x256xf32, #tpu.memory_space<vmem>>, vector<32x256xf32>
    tpu.vector_store %arg10[%c0_24, %c0_25], %32 {strides = array<i32>} : memref<32x256xf32, #tpu.memory_space<vmem>>, vector<32x256xf32>,
    return
  }
  func.func @transform_0(%arg0: i32) -> (i32, i32) {
    %c0_i32 = arith.constant 0 : i32
    %c0_i32_0 = arith.constant 0 : i32
    return %arg0, %c0_i32 : i32, i32
  }
  func.func @transform_1(%arg0: i32) -> (i32, i32) {
    %c0_i32 = arith.constant 0 : i32
    %c0_i32_0 = arith.constant 0 : i32
    %c0_i32_1 = arith.constant 0 : i32
    return %c0_i32, %c0_i32_0 : i32, i32
  }
  func.func @transform_2(%arg0: i32) -> (i32, i32) {
    %c0_i32 = arith.constant 0 : i32
    %c0_i32_0 = arith.constant 0 : i32
    %c0_i32_1 = arith.constant 0 : i32
    return %c0_i32, %c0_i32_0 : i32, i32
  }
  func.func @transform_3(%arg0: i32) -> (i32, i32) {
    %c0_i32 = arith.constant 0 : i32
    %c0_i32_0 = arith.constant 0 : i32
    %c0_i32_1 = arith.constant 0 : i32
    return %c0_i32, %c0_i32_0 : i32, i32
  }
  func.func @transform_4(%arg0: i32) -> (i32, i32) {
    %c0_i32 = arith.constant 0 : i32
    %c0_i32_0 = arith.constant 0 : i32
    %c0_i32_1 = arith.constant 0 : i32
    return %c0_i32, %c0_i32_0 : i32, i32
  }
  func.func @transform_5(%arg0: i32) -> (i32, i32) {
    %c0_i32 = arith.constant 0 : i32
    %c0_i32_0 = arith.constant 0 : i32
    %c0_i32_1 = arith.constant 0 : i32
    return %c0_i32, %c0_i32_0 : i32, i32
  }
  func.func @transform_6(%arg0: i32) -> (i32, i32) {
    %c0_i32 = arith.constant 0 : i32
    %c0_i32_0 = arith.constant 0 : i32
    %c0_i32_1 = arith.constant 0 : i32
    return %c0_i32, %c0_i32_0 : i32, i32
  }
  func.func @transform_7(%arg0: i32) -> (i32, i32) {
    %c0_i32 = arith.constant 0 : i32
    %c0_i32_0 = arith.constant 0 : i32
    %c0_i32_1 = arith.constant 0 : i32
    return %c0_i32, %c0_i32_0 : i32, i32
  }
  func.func @transform_8(%arg0: i32) -> (i32, i32) {
    %c0_i32 = arith.constant 0 : i32
    %c0_i32_0 = arith.constant 0 : i32
    %c0_i32_1 = arith.constant 0 : i32
    return %c0_i32, %c0_i32_0 : i32, i32
  }
  func.func @transform_9(%arg0: i32) -> (i32, i32) {
    %c0_i32 = arith.constant 0 : i32
    %c0_i32_0 = arith.constant 0 : i32
    return %arg0, %c0_i32 : i32, i32
  }
}

</mosaic_0001>

<bundles_post_ra>
// kernel: autoencoder_conv_forward.1
= control target key start
LH: loop header
LB: loop body
LE: loop exit
PB: predicated region body
PF: predicated region fallthrough
CT: control target
= control target key end

     0   :  { %s3279_s0 = inlined_call_operand.hbm [shape: f32[64,256], index: 0, kind: input, shape index: {}]   ;;  %s3280_s1 = inlined_call_operand.hbm [shape: bf16[256,256], index: 1, kind: input, shape index: {}]   ;;  %s3281_s2 = inlined_call_operand.vmem [shape: f32[1,256], index: 2, kind: input, shape index: {}]   ;;  %s3282_s3 = inlined_call_operand.hbm [shape: bf16[256,512], index: 3, kind: input, shape index: {}]   ;;  %s3283_s4 = inlined_call_operand.vmem [shape: f32[1,512], index: 4, kind: input, shape index: {}]   ;;  %s3284_s5 = inlined_call_operand.hbm [shape: bf16[512,256], index: 5, kind: input, shape index: {}]   ;;  %s3285_s6 = inlined_call_operand.vmem [shape: f32[1,256], index: 6, kind: input, shape index: {}]   ;;  %s3286_s7 = inlined_call_operand.hbm [shape: bf16[256,256], index: 7, kind: input, shape index: {}]   ;;  %s3287_s8 = inlined_call_operand.vmem [shape: f32[1,256], index: 8, kind: input, shape index: {}]   ;;  %s3288_s9 = inlined_call_operand.vmem [shape: f32[64,256], index: 9, kind: output, shape index: {}]  }
   0x1   :  { %3296 = sst [smem:[#allocation13_spill]] %s3288_s9 }
   0x2   :  { %14 = vsyncpa [#allocation3], 0 }
   0x3   :  { %16 = vsyncpa [#allocation3 + $0x1], 0 }
   0x4   :  { %17 = vsyncpa [#allocation5], 0 }
   0x5   :  { %18 = vsyncpa [#allocation8], 0  ;;  %s2978_s30 = smov 0   ;;  %s2980_s10 = smov 0  }
   0x6   :  { %s2982_s11 = smov 0   ;;  %s2984_s12 = smov 0  }
   0x7 LB: > { %s3291_s13 = sadd.s32 4294967295, %s2917_s12   ;;  %p44_p0 = scmp.ne.s32.totalorder %s2909_s10, %s2905_s30  ;;  %s2917_s12 = sphi %s2984_s12, %s3314_s12   ;;  %s2913_s11 = sphi %s2982_s11, %s3313_s11   ;;  %s2909_s10 = sphi %s2980_s10, %s3312_s10   ;;  %s2905_s30 = sphi %s2978_s30, %s3311_s30  }
   0x8   : > { %p3000_p1 = scmp.eq.s32.totalorder %s3291_s13, 0  ;;  %p2129_p2 = scmp.ge.s32.totalorder %s2917_s12, 1 }
   0x9   : > { %p249_p3 = scmp.lt.s32.totalorder %s2917_s12, 3  ;;  %s2919_s17 = smov [#allocation4]  }
   0xa   : > { %s3297_s14 = scalar_select %p3000_p1, 1, 0 }
   0xb   : > { %p3008_p4 = por %p3000_p1, %p44_p0  ;;  %p3012_p5 = pnand %p2129_p2, %p249_p3 }
   0xc   : > { %s261_s18 = sshll.u32 %s2919_s17, 4  ;;  %s2920_s20 = smov [#allocation7]   ;;  %s3016_s18 = int_to_ptr.vmem [resolvable:$true] %s261_s18 }
   0xd   : > { %s3298_s15 = scalar_select %p3008_p4, 1, 0 }
   0xe   : > { %s3299_s16 = scalar_select %p3012_p5, 1, 0 }
   0xf   : > { %p2379_p6 = pneg %p3012_p5  ;;  %s293_s21 = sshll.u32 %s2920_s20, 4  ;;  %s3026_s21 = int_to_ptr.vmem [resolvable:$true] %s293_s21 }
  0x10   : > { %s2921_s22 = smov [#allocation6]   ;;  %s2733_s26 = scalar_lea.hbm %s3280_s1, 4096 }
  0x11   : > { %p3022_p7 = pnand %p2379_p6, %p3000_p1  ;;  %s3028_s23 = sshll.u32 %s2921_s22, 4  ;;  %s278_s23 = int_to_ptr.vmem [resolvable:$true] %s3028_s23 }
  0x12   : > { %p2734_p8 = scmp.ne.s32.totalorder %s3280_s1, %s2733_s26  ;;  %p2740_p12 = scmp.lt.u32.totalorder %s2733_s26, %s3280_s1 }
  0x13   : > { %p3038_p9 = pneg %p3022_p7 }
  0x15   : > { %p2736_p10 = pnand %p3038_p9, %p2734_p8 }
  0x17   : > { %p2737_p11 = pneg %p2736_p10 }
  0x19   : > { %p2742_p13 = pnand %p2740_p12, %p2737_p11 }
  0x1b   : > { %2745 = shalt.err (!%p2742_p13)
}
  0x1c   : > { %s2746_s20 = scalar_lea.vmem %s3016_s18, 4096  ;;  %p2754_p6 = scmp.lt.s32.totalorder %s3016_s18, %s3016_s18 }
  0x1d   : > { %p2747_p0 = scmp.ne.s32.totalorder %s3016_s18, %s2746_s20  ;;  %p2755_p1 = scmp.lt.s32.totalorder %s2746_s20, %s2746_s20 }
  0x1f   : > { %p2749_p2 = pnand %p2747_p0, %p3038_p9  ;;  %p2756_p8 = por %p2755_p1, %p2754_p6 }
  0x21   : > { %p2750_p3 = pneg %p2749_p2 }
  0x23   : > { %p2757_p10 = pnand %p2756_p8, %p2750_p3 }
  0x25   : > { %2760 = shalt.err (!%p2757_p10)
}
  0x26   : > { %s3294_s22 = smov 128   ;;  %s3295_s24 = smov 8  }
  0x27   : > { %2382 = dma.hbm_to_vmem [thread:$0]  (!%p3022_p7), %s3280_s1, 4096, %s3016_s18, [#allocation5], %s3294_s22, %s3294_s22, %s3295_s24  }
  0x28   : > { %s2761_s30 = scalar_lea.hbm %s3284_s5, 8192 }
  0x29   : > { %p2762_p1 = scmp.ne.s32.totalorder %s3284_s5, %s2761_s30  ;;  %p2768_p13 = scmp.lt.u32.totalorder %s2761_s30, %s3284_s5 }
  0x2b   : > { %p2764_p11 = pnand %p2762_p1, %p3038_p9 }
  0x2d   : > { %p2765_p12 = pneg %p2764_p11 }
  0x2f   : > { %p2770_p0 = pnand %p2768_p13, %p2765_p12 }
  0x31   : > { %2773 = shalt.err (!%p2770_p0)
}
  0x32   : > { %s2774_s18 = scalar_lea.vmem %s3026_s21, 8192  ;;  %p2782_p8 = scmp.lt.s32.totalorder %s3026_s21, %s3026_s21 }
  0x33   : > { %p2775_p2 = scmp.ne.s32.totalorder %s3026_s21, %s2774_s18  ;;  %p2783_p10 = scmp.lt.s32.totalorder %s2774_s18, %s2774_s18 }
  0x35   : > { %p2777_p3 = pnand %p2775_p2, %p3038_p9  ;;  %p2784_p1 = por %p2783_p10, %p2782_p8 }
  0x37   : > { %p2778_p6 = pneg %p2777_p3 }
  0x39   : > { %p2785_p11 = pnand %p2784_p1, %p2778_p6 }
  0x3b   : > { %2788 = shalt.err (!%p2785_p11)
}
  0x3c   : > { %2388 = dma.hbm_to_vmem [thread:$0]  (!%p3022_p7), %s3284_s5, 8192, %s3026_s21, [#allocation8], %s3294_s22, %s3294_s22, %s3295_s24  }
  0x3d   : > { %s2789_s27 = scalar_lea.hbm %s3282_s3, 8192 }
  0x3e   : > { %p2790_p12 = scmp.ne.s32.totalorder %s3282_s3, %s2789_s27  ;;  %p2796_p2 = scmp.lt.u32.totalorder %s2789_s27, %s3282_s3 }
  0x40   : > { %p2792_p13 = pnand %p2790_p12, %p3038_p9 }
  0x42   : > { %p2793_p0 = pneg %p2792_p13 }
  0x44   : > { %p2798_p3 = pnand %p2796_p2, %p2793_p0 }
  0x46   : > { %2801 = shalt.err (!%p2798_p3)
}
  0x47   : > { %s2802_s18 = scalar_lea.vmem %s278_s23, 8192  ;;  %p2810_p1 = scmp.lt.s32.totalorder %s278_s23, %s278_s23 }
  0x48   : > { %p2803_p6 = scmp.ne.s32.totalorder %s278_s23, %s2802_s18  ;;  %p2811_p11 = scmp.lt.s32.totalorder %s2802_s18, %s2802_s18 }
  0x4a   : > { %p2805_p8 = pnand %p2803_p6, %p3038_p9  ;;  %p2812_p4 = por %p2811_p11, %p2810_p1 }
  0x4c   : > { %p2806_p10 = pneg %p2805_p8 }
  0x4e   : > { %p2813_p5 = pnand %p2812_p4, %p2806_p10 }
  0x50   : > { %2816 = shalt.err (!%p2813_p5)
}
  0x51   : > { %s2924_s21 = smov 256   ;;  %s2925_s9 = smov 16  }
  0x52   : > { %2385 = dma.hbm_to_vmem [thread:$0]  (!%p3022_p7), %s3282_s3, 8192, %s278_s23, [#allocation5], %s2924_s21, %s2924_s21, %s2925_s9  }
  0x53   : > { %s2926_s26 = smov [#allocation9]   ;;  %s2817_s17 = scalar_lea.hbm %s3286_s7, 4096 }
  0x54   : > { %s309_s27 = sshll.u32 %s2926_s26, 4  ;;  %p2818_p4 = scmp.ne.s32.totalorder %s3286_s7, %s2817_s17  ;;  %s310_s27 = int_to_ptr.vmem [resolvable:$true] %s309_s27 }
  0x55   : > { %p2824_p13 = scmp.lt.u32.totalorder %s2817_s17, %s3286_s7 }
  0x56   : > { %p2820_p5 = pnand %p2818_p4, %p3038_p9 }
  0x58   : > { %p2821_p12 = pneg %p2820_p5 }
  0x5a   : > { %p2826_p0 = pnand %p2824_p13, %p2821_p12 }
  0x5c   : > { %2829 = shalt.err (!%p2826_p0)
}
  0x5d   : > { %s2830_s23 = scalar_lea.vmem %s310_s27, 4096  ;;  %p2838_p8 = scmp.lt.s32.totalorder %s310_s27, %s310_s27 }
  0x5e   : > { %p2831_p2 = scmp.ne.s32.totalorder %s310_s27, %s2830_s23  ;;  %p2839_p10 = scmp.lt.s32.totalorder %s2830_s23, %s2830_s23 }
  0x60   : > { %p2833_p3 = pnand %p2831_p2, %p3038_p9  ;;  %p2840_p1 = por %p2839_p10, %p2838_p8 }
  0x62   : > { %p2834_p6 = pneg %p2833_p3 }
  0x64   : > { %p2841_p11 = pnand %p2840_p1, %p2834_p6 }
  0x66   : > { %2844 = shalt.err (!%p2841_p11)
}
  0x67   : > { %s3302_s13 = smov 8   ;;  %s3303_s25 = smov 128  }
  0x68   : > { %2391 = dma.hbm_to_vmem [thread:$0]  (!%p3022_p7), %s3286_s7, 4096, %s310_s27, [#allocation8], %s3303_s25, %s3303_s25, %s3302_s13  }
  0x69   : > { %s3132_s29 = sadd.s32 1, %s2917_s12   ;;  %s31_s19 = sadd.s32 1, %s2913_s11 }
  0x6a   : > { %s28_s26 = ssub.s32 %s2917_s12, %s3132_s29  ;;  %p38_p9 = scmp.ne.s32.totalorder %s2913_s11, %s2909_s10 }
  0x6b   : > { %p29_p4 = scmp.eq.s32.totalorder %s28_s26, 0  ;;  %p39_p5 = scmp.eq.s32.totalorder %s2917_s12, 0 }
  0x6c   : > { %p2400_p12 = scmp.lt.s32.totalorder %s2917_s12, 2  ;;  %s326_s28 = sand.u32 1, %s2913_s11  }
  0x6d   : > { %s3143_s30 = scalar_select %p29_p4, %s2913_s11, %s31_s19  }
  0x6e   : > { %p40_p13 = por %p39_p5, %p38_p9  ;;  %s2135_s17 = sshll.u32 %s326_s28, 6 }
  0x6f   : > { %s2343_s20 = sshll.u32 %s2917_s12, 10  ;;  %s330_s27 = scalar_lea.vmem [#allocation2], %s2135_s17 }
  0x70   : > { %s3149_s22 = scalar_lea.hbm %s3279_s0, %s2343_s20  ;;  %s338_s13 = sshll.u32 %s330_s27, 4  ;;  %s3155_s13 = int_to_ptr.vmem [resolvable:$true] %s338_s13 }
  0x71   : > { %p3151_p7 = pnand %p2400_p12, %p40_p13  ;;  %s3157_s24 = scalar_lea.sflag [#allocation3], %s326_s28 }
  0x72   : > { %s2845_s19 = scalar_lea.hbm %s3149_s22, 1024  ;;  %s2850_s20 = scalar_lea.hbm %s3279_s0, 2048 }
  0x73   : > { %p2846_p0 = scmp.ne.s32.totalorder %s3149_s22, %s2845_s19  ;;  %p2847_p2 = pneg %p3151_p7 }
  0x74   : > { %p2851_p8 = scmp.lt.u32.totalorder %s3149_s22, %s3279_s0  ;;  %p2852_p10 = scmp.lt.u32.totalorder %s2850_s20, %s2845_s19 }
  0x75   : > { %p2848_p3 = pnand %p2847_p2, %p2846_p0  ;;  %p2854_p11 = scmp.lt.u32.totalorder %s2845_s19, %s3149_s22 }
  0x76   : > { %p2853_p1 = por %p2852_p10, %p2851_p8 }
  0x77   : > { %p2849_p6 = pneg %p2848_p3 }
  0x78   : > { %p2855_p9 = por %p2854_p11, %p2853_p1 }
  0x7a   : > { %p2856_p4 = pnand %p2855_p9, %p2849_p6 }
  0x7c   : > { %2859 = shalt.err (!%p2856_p4)
}
  0x7d   : > { %s2860_s28 = scalar_lea.vmem %s3155_s13, 1024  ;;  %s2927_s27 = smov [#allocation2]  }
  0x7e   : > { %p2861_p5 = scmp.ne.s32.totalorder %s3155_s13, %s2860_s28  ;;  %s2865_s26 = sshll.u32 %s2927_s27, 4  ;;  %s2866_s26 = int_to_ptr.vmem [resolvable:$false] %s2865_s26 }
  0x7f   : > { %s2867_s17 = scalar_lea.vmem %s2866_s26, 2048  ;;  %p2868_p0 = scmp.lt.s32.totalorder %s3155_s13, %s2866_s26 }
  0x80   : > { %p2863_p12 = pnand %p2861_p5, %p2847_p2  ;;  %p2869_p3 = scmp.lt.s32.totalorder %s2867_s17, %s2860_s28 }
  0x82   : > { %p2864_p13 = pneg %p2863_p12  ;;  %p2870_p8 = por %p2869_p3, %p2868_p0 }
  0x84   : > { %p2871_p10 = pnand %p2870_p8, %p2864_p13 }
  0x86   : > { %2874 = shalt.err (!%p2871_p10)
}
  0x87   : > { %2395 = dma.hbm_to_vmem [thread:$0]  (!%p3151_p7), %s3149_s22, 1024, %s3155_s13, %s3157_s24, %s2924_s21, %s2924_s21, %s2925_s9  }
  0x88   : > { %p3305_p2 = scmp.ne.s32.totalorder %s3299_s16, 0 }
  0x89   : > { %s352_s19 = sand.u32 (!%p3305_p2), 1, %s2909_s10   ;;  %p3306_p6 = scmp.ne.s32.totalorder (!%p3305_p2), %s3298_s15, 0 }
  0x8a   : > { %350 = sbr.rel (%p3305_p2) target bundleno = 1174 (0x496), region = 56  ;;  %s2140_s20 = sshll.u32 (!%p3305_p2), %s352_s19, 6 }
  0x8b   : > { %s353_s18 = scalar_lea.sflag (!%p3305_p2), [#allocation3], %s352_s19  ;;  %s3191_s23 = scalar_lea.vmem (!%p3305_p2), [#allocation2], %s2140_s20 }
  0x91   : > { %2892 = dma.done.wait (%p3306_p6), %s353_s18, 1024  }
  0x92   : > { %2894 = vsyncadd (%p3306_p6), %s353_s18, 4294966272  ;;  %p3307_p1 = scmp.ne.s32.totalorder %s3297_s14, 0 }
  0x94   : > { %2896 = dma.done.wait (%p3307_p1), [#allocation5], 12288  }
  0x95   : > { %2898 = vsyncadd (%p3307_p1), [#allocation5], 4294955008 }
  0x96   : > { %2900 = dma.done.wait (%p3307_p1), [#allocation8], 12288  }
  0x97   : > { %2902 = vsyncadd (%p3307_p1), [#allocation8], 4294955008  ;;  %v2445_v0 = vld [vmem:[#allocation4 + $0x4] ss:$8 sps:$4 sm:$0xff]   ;;  %v2447_v1 = vld [vmem:[#allocation4] ss:$8 sps:$4 sm:$0xff]  }
  0x98   : > { %632 = vmatprep.subr.bf16.mxu0 %v2445_v0  ;;  %v2448_v2 = vld [vmem:[#allocation4 + $0x14] ss:$8 sps:$4 sm:$0xff]   ;;  %v2450_v3 = vld [vmem:[#allocation4 + $0x10] ss:$8 sps:$4 sm:$0xff]   ;;  %v2451_v4 = vld [vmem:[#allocation4 + $0x24] ss:$8 sps:$4 sm:$0xff]  }
  0x99   : > { %633 = vmatpush1.bf16.msra.mxu0 %v2447_v1  ;;  %v2453_v5 = vld [vmem:[#allocation4 + $0x20] ss:$8 sps:$4 sm:$0xff]   ;;  %v2454_v6 = vld [vmem:[#allocation4 + $0x34] ss:$8 sps:$4 sm:$0xff]   ;;  %v2456_v7 = vld [vmem:[#allocation4 + $0x30] ss:$8 sps:$4 sm:$0xff]  }
  0x9a   : > { %634 = vmatprep.subr.bf16.mxu0 %v2448_v2  ;;  %v2457_v8 = vld [vmem:[#allocation4 + $0x44] ss:$8 sps:$4 sm:$0xff]   ;;  %v2459_v9 = vld [vmem:[#allocation4 + $0x40] ss:$8 sps:$4 sm:$0xff]   ;;  %v2460_v10 = vld [vmem:[#allocation4 + $0x54] ss:$8 sps:$4 sm:$0xff]  }
  0x9b   : > { %v2462_v11 = vld [vmem:[#allocation4 + $0x50] ss:$8 sps:$4 sm:$0xff]   ;;  %v2463_v12 = vld [vmem:[#allocation4 + $0x64] ss:$8 sps:$4 sm:$0xff]   ;;  %v2465_v16 = vld [vmem:[#allocation4 + $0x60] ss:$8 sps:$4 sm:$0xff]  }
  0x9c   : > { %v417_v13 = vld [vmem:[%s3191_s23 + $0x8] sm:$0xff]  ;;  %v419_v14 = vld [vmem:[%s3191_s23 + $0x18] sm:$0xff]  ;;  %v2493_v18 = vld [vmem:[#allocation6 + $0x4] ss:$16 sps:$4 sm:$0xff]   ;;  %s3308_s13 = sadd.s32 4294967295, %s2917_s12   ;;  %s3309_s19 = sld [smem:[#allocation13_spill]] }
  0x9d   : > { %635 = vmatpush1.bf16.msra.mxu0 %v2450_v3  ;;  %v425_v15 = vpack.c.bf16 %v419_v14, %v417_v13  ;;  %v2466_v17 = vld [vmem:[#allocation4 + $0x74] ss:$8 sps:$4 sm:$0xff]   ;;  %v2468_v19 = vld [vmem:[#allocation4 + $0x70] ss:$8 sps:$4 sm:$0xff]   ;;  %1103 = vmatprep.subr.bf16.mxu1 %v2493_v18  ;;  %v2469_v22 = vld [vmem:[#allocation4 + $0x84] ss:$8 sps:$4 sm:$0xff]  }
  0x9e   : > { %636 = vmatprep.subr.bf16.mxu0 %v2451_v4  ;;  %v2498_v20 = vld [vmem:[#allocation6] ss:$16 sps:$4 sm:$0xff]   ;;  %v2499_v21 = vld [vmem:[#allocation6 + $0x24] ss:$16 sps:$4 sm:$0xff]   ;;  %v421_v56 = vld [vmem:[%s3191_s23 + $0x28] sm:$0xff]  ;;  %s2145_s25 = sshll.u32 %s3308_s13, 2 }
  0x9f   : > { %664 = vmatprep.mubr.bf16.mxu0 %v425_v15  ;;  %1104 = vmatpush1.bf16.msra.mxu1 %v2498_v20  ;;  %v2504_v23 = vld [vmem:[#allocation6 + $0x20] ss:$16 sps:$4 sm:$0xff]   ;;  %v2505_v24 = vld [vmem:[#allocation6 + $0x44] ss:$16 sps:$4 sm:$0xff]   ;;  %v423_v57 = vld [vmem:[%s3191_s23 + $0x38] sm:$0xff]  ;;  %p410_p7 = scmp.lt.s32.totalorder %s2145_s25, 7 }
  0xa0   : > { %1105 = vmatprep.subr.bf16.mxu1 %v2499_v21  ;;  %v2471_v25 = vld [vmem:[#allocation4 + $0x80] ss:$8 sps:$4 sm:$0xff]   ;;  %v2472_v26 = vld [vmem:[#allocation4 + $0x94] ss:$8 sps:$4 sm:$0xff]   ;;  %v2474_v29 = vld [vmem:[#allocation4 + $0x90] ss:$8 sps:$4 sm:$0xff]   ;;  %v427_v1 = vpack.c.bf16 %v423_v57, %v421_v56 }
  0xa1   : > { %637 = vmatpush1.bf16.msra.mxu0 %v2453_v5  ;;  %v2510_v27 = vld [vmem:[#allocation6 + $0x40] ss:$16 sps:$4 sm:$0xff]   ;;  %v2511_v28 = vld [vmem:[#allocation6 + $0x64] ss:$16 sps:$4 sm:$0xff]   ;;  %v2497_v58 = vld [vmem:[#allocation6 + $0xc] ss:$16 sps:$4 sm:$0xff]  }
  0xa2   : > { %638 = vmatprep.subr.bf16.mxu0 %v2454_v6  ;;  %v2475_v30 = vld [vmem:[#allocation4 + $0xa4] ss:$8 sps:$4 sm:$0xff]   ;;  %v2516_v31 = vld [vmem:[#allocation6 + $0x60] ss:$16 sps:$4 sm:$0xff]   ;;  %v2478_v34 = vld [vmem:[#allocation4 + $0xb4] ss:$8 sps:$4 sm:$0xff]  }
  0xa3   : > { %1106 = vmatpush1.bf16.msra.mxu1 %v2504_v23  ;;  %v2517_v32 = vld [vmem:[#allocation6 + $0x84] ss:$16 sps:$4 sm:$0xff]   ;;  %v2477_v33 = vld [vmem:[#allocation4 + $0xa0] ss:$8 sps:$4 sm:$0xff]   ;;  %v2480_v37 = vld [vmem:[#allocation4 + $0xb0] ss:$8 sps:$4 sm:$0xff]  }
  0xa4   : > { %1107 = vmatprep.subr.bf16.mxu1 %v2505_v24  ;;  %v2522_v35 = vld [vmem:[#allocation6 + $0x80] ss:$16 sps:$4 sm:$0xff]   ;;  %v2523_v36 = vld [vmem:[#allocation6 + $0xa4] ss:$16 sps:$4 sm:$0xff]   ;;  %v2495_v60 = vld [vmem:[#allocation6 + $0x8] ss:$16 sps:$4 sm:$0xff]  }
  0xa5   : > { %639 = vmatpush1.bf16.msra.mxu0 %v2456_v7  ;;  %v2481_v38 = vld [vmem:[#allocation4 + $0xc4] ss:$8 sps:$4 sm:$0xff]   ;;  %v2528_v39 = vld [vmem:[#allocation6 + $0xa0] ss:$16 sps:$4 sm:$0xff]   ;;  %v2484_v42 = vld [vmem:[#allocation4 + $0xd4] ss:$8 sps:$4 sm:$0xff]  }
  0xa6   : > { %640 = vmatprep.subr.bf16.mxu0 %v2457_v8  ;;  %v2529_v40 = vld [vmem:[#allocation6 + $0xc4] ss:$16 sps:$4 sm:$0xff]   ;;  %v2483_v41 = vld [vmem:[#allocation4 + $0xc0] ss:$8 sps:$4 sm:$0xff]   ;;  %v2486_v45 = vld [vmem:[#allocation4 + $0xd0] ss:$8 sps:$4 sm:$0xff]  }
  0xa7   : > { %1108 = vmatpush1.bf16.msra.mxu1 %v2510_v27  ;;  %v2534_v43 = vld [vmem:[#allocation6 + $0xc0] ss:$16 sps:$4 sm:$0xff]   ;;  %v2535_v44 = vld [vmem:[#allocation6 + $0xe4] ss:$16 sps:$4 sm:$0xff]   ;;  %v2503_v63 = vld [vmem:[#allocation6 + $0x2c] ss:$16 sps:$4 sm:$0xff]  }
  0xa8   : > { %1109 = vmatprep.subr.bf16.mxu1 %v2511_v28  ;;  %v2487_v46 = vld [vmem:[#allocation4 + $0xe4] ss:$8 sps:$4 sm:$0xff]   ;;  %v2540_v47 = vld [vmem:[#allocation6 + $0xe0] ss:$16 sps:$4 sm:$0xff]   ;;  %v2490_v50 = vld [vmem:[#allocation4 + $0xf4] ss:$8 sps:$4 sm:$0xff]  }
  0xa9   : > { %641 = vmatpush1.bf16.msra.mxu0 %v2459_v9  ;;  %v2541_v48 = vld [vmem:[#allocation6 + $0x104] ss:$16 sps:$4 sm:$0xff]   ;;  %v2489_v49 = vld [vmem:[#allocation4 + $0xe0] ss:$8 sps:$4 sm:$0xff]   ;;  %v2492_v52 = vld [vmem:[#allocation4 + $0xf0] ss:$8 sps:$4 sm:$0xff]  }
  0xaa   : > { %642 = vmatprep.subr.bf16.mxu0 %v2460_v10  ;;  %v2546_v51 = vld [vmem:[#allocation6 + $0x100] ss:$16 sps:$4 sm:$0xff]   ;;  %v2547_v54 = vld [vmem:[#allocation6 + $0x124] ss:$16 sps:$4 sm:$0xff]   ;;  %v2501_v5 = vld [vmem:[#allocation6 + $0x28] ss:$16 sps:$4 sm:$0xff]  }
  0xab   : > { %1110 = vmatpush1.bf16.msra.mxu1 %v2516_v31  ;;  %v416_v53 = vld [vmem:[%s3191_s23] sm:$0xff]  ;;  %v418_v55 = vld [vmem:[%s3191_s23 + $0x10] sm:$0xff]  ;;  %v2509_v6 = vld [vmem:[#allocation6 + $0x4c] ss:$16 sps:$4 sm:$0xff]   ;;  %s3316_s25 = smov (!%p410_p7, %s2145_s25), 7 }
  0xac   : > { %1111 = vmatprep.subr.bf16.mxu1 %v2517_v32  ;;  %v2552_v59 = vld [vmem:[#allocation6 + $0x120] ss:$16 sps:$4 sm:$0xff]   ;;  %v2553_v61 = vld [vmem:[#allocation6 + $0x144] ss:$16 sps:$4 sm:$0xff]   ;;  %v424_v62 = vpack.c.bf16 %v418_v55, %v416_v53  ;;  %v2507_v9 = vld [vmem:[#allocation6 + $0x48] ss:$16 sps:$4 sm:$0xff]  }
  0xad   : > { %643 = vmatpush1.bf16.msra.mxu0 %v2462_v11  ;;  %v2558_v0 = vld [vmem:[#allocation6 + $0x140] ss:$16 sps:$4 sm:$0xff]   ;;  %v2559_v2 = vld [vmem:[#allocation6 + $0x164] ss:$16 sps:$4 sm:$0xff]   ;;  %v2515_v11 = vld [vmem:[#allocation6 + $0x6c] ss:$16 sps:$4 sm:$0xff]  }
  0xae   : > { %644 = vmatprep.subr.bf16.mxu0 %v2463_v12  ;;  %v420_v3 = vld [vmem:[%s3191_s23 + $0x20] sm:$0xff]  ;;  %v422_v4 = vld [vmem:[%s3191_s23 + $0x30] sm:$0xff]  ;;  %v2513_v14 = vld [vmem:[#allocation6 + $0x68] ss:$16 sps:$4 sm:$0xff]   ;;  %s2344_s27 = sshll.u32 %s3316_s25, 4 }
  0xaf   : > { %1112 = vmatpush1.bf16.msra.mxu1 %v2522_v35  ;;  %v2564_v7 = vld [vmem:[#allocation6 + $0x160] ss:$16 sps:$4 sm:$0xff]   ;;  %v2565_v8 = vld [vmem:[#allocation6 + $0x184] ss:$16 sps:$4 sm:$0xff]   ;;  %v426_v10 = vpack.c.bf16 %v422_v4, %v420_v3  ;;  %v2521_v15 = vld [vmem:[#allocation6 + $0x8c] ss:$16 sps:$4 sm:$0xff]   ;;  %s414_s20 = scalar_lea.vmem %s3309_s19, %s2344_s27 }
  0xb0   : > { %1113 = vmatprep.subr.bf16.mxu1 %v2523_v36  ;;  %v2570_v12 = vld [vmem:[#allocation6 + $0x180] ss:$16 sps:$4 sm:$0xff]   ;;  %v2571_v13 = vld [vmem:[#allocation6 + $0x1a4] ss:$16 sps:$4 sm:$0xff]   ;;  %v2525_v18 = vld [vmem:[#allocation6 + $0xa8] ss:$16 sps:$4 sm:$0xff]  }
  0xb1   : > { %645 = vmatpush1.bf16.msra.mxu0 %v2465_v16  ;;  %v2519_v16 = vld [vmem:[#allocation6 + $0x88] ss:$16 sps:$4 sm:$0xff]   ;;  %v2539_v21 = vld [vmem:[#allocation6 + $0xec] ss:$16 sps:$4 sm:$0xff]   ;;  %v2576_v35 = vld [vmem:[#allocation6 + $0x1a0] ss:$16 sps:$4 sm:$0xff]  }
  0xb2   : > { %646 = vmatprep.subr.bf16.mxu0 %v2466_v17  ;;  %v2527_v17 = vld [vmem:[#allocation6 + $0xac] ss:$16 sps:$4 sm:$0xff]   ;;  %v2531_v20 = vld [vmem:[#allocation6 + $0xc8] ss:$16 sps:$4 sm:$0xff]   ;;  %v2577_v36 = vld [vmem:[#allocation6 + $0x1c4] ss:$16 sps:$4 sm:$0xff]  }
  0xb3   : > { %1114 = vmatpush1.bf16.msra.mxu1 %v2528_v39  ;;  %v2545_v23 = vld [vmem:[#allocation6 + $0x10c] ss:$16 sps:$4 sm:$0xff]   ;;  %v2543_v24 = vld [vmem:[#allocation6 + $0x108] ss:$16 sps:$4 sm:$0xff]   ;;  %v2582_v39 = vld [vmem:[#allocation6 + $0x1c0] ss:$16 sps:$4 sm:$0xff]  }
  0xb4   : > { %1115 = vmatprep.subr.bf16.mxu1 %v2529_v40  ;;  %v2557_v27 = vld [vmem:[#allocation6 + $0x14c] ss:$16 sps:$4 sm:$0xff]   ;;  %v2555_v28 = vld [vmem:[#allocation6 + $0x148] ss:$16 sps:$4 sm:$0xff]   ;;  %v2583_v40 = vld [vmem:[#allocation6 + $0x1e4] ss:$16 sps:$4 sm:$0xff]  }
  0xb5   : > { %647 = vmatpush1.bf16.msra.mxu0 %v2468_v19  ;;  %v2533_v19 = vld [vmem:[#allocation6 + $0xcc] ss:$16 sps:$4 sm:$0xff]   ;;  %v2567_v32 = vld [vmem:[#allocation6 + $0x188] ss:$16 sps:$4 sm:$0xff]  }
  0xb6   : > { %648 = vmatprep.subr.bf16.mxu0 %v2469_v22  ;;  %v2537_v22 = vld [vmem:[#allocation6 + $0xe8] ss:$16 sps:$4 sm:$0xff]   ;;  %v2569_v31 = vld [vmem:[#allocation6 + $0x18c] ss:$16 sps:$4 sm:$0xff]  }
  0xb7   : > { %1116 = vmatpush1.bf16.msra.mxu1 %v2534_v43  ;;  %v2588_v43 = vld [vmem:[#allocation6 + $0x1e0] ss:$16 sps:$4 sm:$0xff]  }
  0xb8   : > { %1117 = vmatprep.subr.bf16.mxu1 %v2535_v44  ;;  %v2591_v44 = vld [vmem:[#allocation7 + $0x4] ss:$8 sps:$4 sm:$0xff]   ;;  %v2589_v3 = vld [vmem:[#allocation7] ss:$8 sps:$4 sm:$0xff]  }
  0xb9   : > { %649 = vmatpush1.bf16.msra.mxu0 %v2471_v25  ;;  %v2551_v25 = vld [vmem:[#allocation6 + $0x12c] ss:$16 sps:$4 sm:$0xff]  }
  0xba   : > { %650 = vmatprep.subr.bf16.mxu0 %v2472_v26  ;;  %v2549_v26 = vld [vmem:[#allocation6 + $0x128] ss:$16 sps:$4 sm:$0xff]  }
  0xbb   : > { %1118 = vmatpush1.bf16.msra.mxu1 %v2540_v47 }
  0xbc   : > { %1119 = vmatprep.subr.bf16.mxu1 %v2541_v48  ;;  %v460_v48 = vld [vmem:[%s3281_s2] sm:$0x3] }
  0xbd   : > { %651 = vmatpush1.bf16.msra.mxu0 %v2474_v29  ;;  %v2563_v29 = vld [vmem:[#allocation6 + $0x16c] ss:$16 sps:$4 sm:$0xff]  }
  0xbe   : > { %652 = vmatprep.subr.bf16.mxu0 %v2475_v30  ;;  %v2561_v30 = vld [vmem:[#allocation6 + $0x168] ss:$16 sps:$4 sm:$0xff]  }
  0xbf   : > { %1120 = vmatpush1.bf16.msra.mxu1 %v2546_v51 }
  0xc0   : > { %1121 = vmatprep.subr.bf16.mxu1 %v2547_v54 }
  0xc1   : > { %653 = vmatpush1.bf16.msra.mxu0 %v2477_v33  ;;  %v2575_v33 = vld [vmem:[#allocation6 + $0x1ac] ss:$16 sps:$4 sm:$0xff]  }
  0xc2   : > { %654 = vmatprep.subr.bf16.mxu0 %v2478_v34  ;;  %v2573_v34 = vld [vmem:[#allocation6 + $0x1a8] ss:$16 sps:$4 sm:$0xff]  }
  0xc3   : > { %1122 = vmatpush1.bf16.msra.mxu1 %v2552_v59 }
  0xc4   : > { %1123 = vmatprep.subr.bf16.mxu1 %v2553_v61 }
  0xc5   : > { %655 = vmatpush1.bf16.msra.mxu0 %v2480_v37  ;;  %v2581_v37 = vld [vmem:[#allocation6 + $0x1cc] ss:$16 sps:$4 sm:$0xff]  }
  0xc6   : > { %656 = vmatprep.subr.bf16.mxu0 %v2481_v38  ;;  %v2579_v38 = vld [vmem:[#allocation6 + $0x1c8] ss:$16 sps:$4 sm:$0xff]  }
  0xc7   : > { %1124 = vmatpush1.bf16.msra.mxu1 %v2558_v0 }
  0xc8   : > { %1125 = vmatprep.subr.bf16.mxu1 %v2559_v2 }
  0xc9   : > { %657 = vmatpush1.bf16.msra.mxu0 %v2483_v41  ;;  %v2587_v41 = vld [vmem:[#allocation6 + $0x1ec] ss:$16 sps:$4 sm:$0xff]  }
  0xca   : > { %658 = vmatprep.subr.bf16.mxu0 %v2484_v42  ;;  %v2585_v42 = vld [vmem:[#allocation6 + $0x1e8] ss:$16 sps:$4 sm:$0xff]  }
  0xcb   : > { %1126 = vmatpush1.bf16.msra.mxu1 %v2564_v7 }
  0xcc   : > { %1127 = vmatprep.subr.bf16.mxu1 %v2565_v8 }
  0xcd   : > { %659 = vmatpush1.bf16.msra.mxu0 %v2486_v45  ;;  %v462_v45 = vlaneseq }
  0xce   : > { %660 = vmatprep.subr.bf16.mxu0 %v2487_v46 }
  0xcf   : > { %1128 = vmatpush1.bf16.msra.mxu1 %v2570_v12  ;;  %v3213_v46 = vshrl.u32 %v462_v45, 7  ;;  %v2636_v45 = vld [vmem:[#allocation7 + $0xf4] ss:$8 sps:$4 sm:$0xff]  }
  0xd0   : > { %1129 = vmatprep.subr.bf16.mxu1 %v2571_v13 }
  0xd1   : > { %661 = vmatpush1.bf16.msra.mxu0 %v2489_v49  ;;  %v3216_v47 = vsub.s32 0, %v3213_v46  ;;  %v3222_v49 = vsub.s32 1, %v3213_v46 }
  0xd2   : > { %662 = vmatprep.subr.bf16.mxu0 %v2490_v50 }
  0xd3   : > { %1130 = vmatpush1.bf16.msra.mxu1 %v2576_v35  ;;  %v465_v50 = vrot.slane %v460_v48, %v3216_v47  ;;  %v469_v51 = vrot.slane %v460_v48, %v3222_v49  ;;  %v2621_v35 = vld [vmem:[#allocation7 + $0xa4] ss:$8 sps:$4 sm:$0xff]   ;;  %v2634_v48 = vld [vmem:[#allocation7 + $0xf0] ss:$8 sps:$4 sm:$0xff]  }
  0xd4   : > { %1131 = vmatprep.subr.bf16.mxu1 %v2577_v36  ;;  %v2619_v36 = vld [vmem:[#allocation7 + $0xa0] ss:$8 sps:$4 sm:$0xff]  }
  0xd5   : > { %663 = vmatpush1.bf16.msra.mxu0 %v2492_v52 }
  0xd6   : > { %1156 = vmatprep.subr.bf16.mxu0 %v2497_v58 }
  0xd7   : > { %1132 = vmatpush1.bf16.msra.mxu1 %v2582_v39  ;;  %v2627_v39 = vld [vmem:[#allocation7 + $0xc4] ss:$8 sps:$4 sm:$0xff]  }
  0xd8   : > { %665 = vmatmul.mubr.bf16.vlgmr.msra.gmra.mrb[0].mxu0 %v424_v62  ;;  %1133 = vmatprep.subr.bf16.mxu1 %v2583_v40  ;;  %v2625_v40 = vld [vmem:[#allocation7 + $0xc0] ss:$8 sps:$4 sm:$0xff]  }
  0xd9   : > { %674 = vmatprep.mubr.bf16.mxu0 %v427_v1  ;;  %1157 = vmatpush1.bf16.msra.mxu0 %v2495_v60 }
  0xda   : > { %1158 = vmatprep.subr.bf16.mxu0 %v2503_v63 }
  0xdb   : > { %1134 = vmatpush1.bf16.msra.mxu1 %v2588_v43  ;;  %v2633_v43 = vld [vmem:[#allocation7 + $0xe4] ss:$8 sps:$4 sm:$0xff]  }
  0xdc   : > { %1629 = vmatprep.subr.bf16.mxu1 %v2591_v44  ;;  %v2631_v44 = vld [vmem:[#allocation7 + $0xe0] ss:$8 sps:$4 sm:$0xff]  }
  0xdd   : > { %1159 = vmatpush1.bf16.msra.mxu0 %v2501_v5 }
  0xde   : > { %1160 = vmatprep.subr.bf16.mxu0 %v2509_v6  ;;  %v2594_v6 = vld [vmem:[#allocation7 + $0x14] ss:$8 sps:$4 sm:$0xff]  }
  0xe0   : > { %675 = vmatmul.mubr.bf16.gmra.mrb[4].mxu0 %v426_v10 }
  0xe1   : > { %1161 = vmatpush1.bf16.msra.mxu0 %v2507_v9 }
  0xe2   : > { %1162 = vmatprep.subr.bf16.mxu0 %v2515_v11 }
  0xe5   : > { %1163 = vmatpush1.bf16.msra.mxu0 %v2513_v14  ;;  %v2592_v14 = vld [vmem:[#allocation7 + $0x10] ss:$8 sps:$4 sm:$0xff]  }
  0xe6   : > { %1164 = vmatprep.subr.bf16.mxu0 %v2521_v15 }
  0xe9   : > { %1165 = vmatpush1.bf16.msra.mxu0 %v2519_v16  ;;  %v2597_v16 = vld [vmem:[#allocation7 + $0x24] ss:$8 sps:$4 sm:$0xff]  }
  0xea   : > { %1166 = vmatprep.subr.bf16.mxu0 %v2527_v17 }
  0xed   : > { %1167 = vmatpush1.bf16.msra.mxu0 %v2525_v18 }
  0xee   : > { %1168 = vmatprep.subr.bf16.mxu0 %v2533_v19 }
  0xf1   : > { %1169 = vmatpush1.bf16.msra.mxu0 %v2531_v20  ;;  %v2595_v20 = vld [vmem:[#allocation7 + $0x20] ss:$8 sps:$4 sm:$0xff]  }
  0xf2   : > { %1170 = vmatprep.subr.bf16.mxu0 %v2539_v21  ;;  %v2600_v21 = vld [vmem:[#allocation7 + $0x34] ss:$8 sps:$4 sm:$0xff]  }
  0xf5   : > { %1171 = vmatpush1.bf16.msra.mxu0 %v2537_v22  ;;  %v2598_v22 = vld [vmem:[#allocation7 + $0x30] ss:$8 sps:$4 sm:$0xff]  }
  0xf6   : > { %1172 = vmatprep.subr.bf16.mxu0 %v2545_v23  ;;  %v2603_v23 = vld [vmem:[#allocation7 + $0x44] ss:$8 sps:$4 sm:$0xff]  }
  0xf9   : > { %1173 = vmatpush1.bf16.msra.mxu0 %v2543_v24  ;;  %v2601_v24 = vld [vmem:[#allocation7 + $0x40] ss:$8 sps:$4 sm:$0xff]  }
  0xfa   : > { %1174 = vmatprep.subr.bf16.mxu0 %v2551_v25  ;;  %v2606_v25 = vld [vmem:[#allocation7 + $0x54] ss:$8 sps:$4 sm:$0xff]  }
  0xfd   : > { %1175 = vmatpush1.bf16.msra.mxu0 %v2549_v26  ;;  %v2604_v26 = vld [vmem:[#allocation7 + $0x50] ss:$8 sps:$4 sm:$0xff]  }
  0xfe   : > { %1176 = vmatprep.subr.bf16.mxu0 %v2557_v27  ;;  %v2609_v27 = vld [vmem:[#allocation7 + $0x64] ss:$8 sps:$4 sm:$0xff]  }
 0x101   : > { %1177 = vmatpush1.bf16.msra.mxu0 %v2555_v28  ;;  %v2607_v28 = vld [vmem:[#allocation7 + $0x60] ss:$8 sps:$4 sm:$0xff]  }
 0x102   : > { %1178 = vmatprep.subr.bf16.mxu0 %v2563_v29  ;;  %v2612_v29 = vld [vmem:[#allocation7 + $0x74] ss:$8 sps:$4 sm:$0xff]  }
 0x105   : > { %1179 = vmatpush1.bf16.msra.mxu0 %v2561_v30  ;;  %v2610_v30 = vld [vmem:[#allocation7 + $0x70] ss:$8 sps:$4 sm:$0xff]  }
 0x106   : > { %1180 = vmatprep.subr.bf16.mxu0 %v2569_v31  ;;  %v2615_v31 = vld [vmem:[#allocation7 + $0x84] ss:$8 sps:$4 sm:$0xff]  }
 0x109   : > { %1181 = vmatpush1.bf16.msra.mxu0 %v2567_v32  ;;  %v2613_v32 = vld [vmem:[#allocation7 + $0x80] ss:$8 sps:$4 sm:$0xff]  }
 0x10a   : > { %1182 = vmatprep.subr.bf16.mxu0 %v2575_v33  ;;  %v2618_v33 = vld [vmem:[#allocation7 + $0x94] ss:$8 sps:$4 sm:$0xff]  }
 0x10d   : > { %1183 = vmatpush1.bf16.msra.mxu0 %v2573_v34  ;;  %v2616_v34 = vld [vmem:[#allocation7 + $0x90] ss:$8 sps:$4 sm:$0xff]  }
 0x10e   : > { %1184 = vmatprep.subr.bf16.mxu0 %v2581_v37  ;;  %v2624_v37 = vld [vmem:[#allocation7 + $0xb4] ss:$8 sps:$4 sm:$0xff]  }
 0x111   : > { %1185 = vmatpush1.bf16.msra.mxu0 %v2579_v38  ;;  %v2622_v38 = vld [vmem:[#allocation7 + $0xb0] ss:$8 sps:$4 sm:$0xff]  }
 0x112   : > { %1186 = vmatprep.subr.bf16.mxu0 %v2587_v41  ;;  %v2630_v41 = vld [vmem:[#allocation7 + $0xd4] ss:$8 sps:$4 sm:$0xff]  }
 0x115   : > { %1187 = vmatpush1.bf16.msra.mxu0 %v2585_v42  ;;  %v2628_v42 = vld [vmem:[#allocation7 + $0xd0] ss:$8 sps:$4 sm:$0xff]  }
 0x1ab   : > { %v666_v52 = vpop.f32.mrb[0].mxu0 }
 0x1ac   : > { %v667_v53 = vadd.f32 %v666_v52, %v465_v50  ;;  %v668_v54 = vpop.f32.mrb[1].mxu0  ;;  %v2687_v52 = vld [vmem:[#allocation9 + $0x4] ss:$8 sps:$4 sm:$0xff]  }
 0x1ad   : > { %v669_v55 = vadd.f32 %v668_v54, %v469_v51  ;;  %v670_v56 = vpop.f32.mrb[2].mxu0  ;;  %1951 = vmatprep.subr.bf16.mxu0 %v2687_v52  ;;  %v2688_v54 = vld [vmem:[#allocation9 + $0x10] ss:$8 sps:$4 sm:$0xff]  }
 0x1ae   : > { %v671_v57 = vadd.f32 %v670_v56, %v465_v50  ;;  %v672_v58 = vpop.f32.mrb[3].mxu0  ;;  %v685_v60 = vmax.f32 %v667_v53, 0.0  ;;  %v2690_v53 = vld [vmem:[#allocation9 + $0x14] ss:$8 sps:$4 sm:$0xff]   ;;  %v2691_v56 = vld [vmem:[#allocation9 + $0x20] ss:$8 sps:$4 sm:$0xff]  }
 0x1af   : > { %v673_v59 = vadd.f32 %v672_v58, %v469_v51  ;;  %v686_v62 = vmax.f32 %v669_v55, 0.0  ;;  %v2693_v55 = vld [vmem:[#allocation9 + $0x24] ss:$8 sps:$4 sm:$0xff]   ;;  %v2694_v58 = vld [vmem:[#allocation9 + $0x30] ss:$8 sps:$4 sm:$0xff]  }
 0x1b0   : > { %v687_v61 = vmax.f32 %v671_v57, 0.0  ;;  %v2696_v57 = vld [vmem:[#allocation9 + $0x34] ss:$8 sps:$4 sm:$0xff]  }
 0x1b1   : > { %v688_v63 = vmax.f32 %v673_v59, 0.0  ;;  %v2699_v59 = vld [vmem:[#allocation9 + $0x44] ss:$8 sps:$4 sm:$0xff]  }
 0x1b2   : > { %v693_v0 = vpack.c.bf16 %v687_v61, %v685_v60  ;;  %v2697_v60 = vld [vmem:[#allocation9 + $0x40] ss:$8 sps:$4 sm:$0xff]   ;;  %v2702_v61 = vld [vmem:[#allocation9 + $0x54] ss:$8 sps:$4 sm:$0xff]  }
 0x1b3   : > { %v676_v1 = vpop.f32.mrb[4].mxu0  ;;  %v694_v2 = vpack.c.bf16 %v688_v63, %v686_v62  ;;  %v2700_v62 = vld [vmem:[#allocation9 + $0x50] ss:$8 sps:$4 sm:$0xff]   ;;  %v2705_v63 = vld [vmem:[#allocation9 + $0x64] ss:$8 sps:$4 sm:$0xff]  }
 0x1b4   : > { %v677_v4 = vadd.f32 %v676_v1, %v465_v50  ;;  %v678_v5 = vpop.f32.mrb[5].mxu0  ;;  %v2708_v1 = vld [vmem:[#allocation9 + $0x74] ss:$8 sps:$4 sm:$0xff]  }
 0x1b5   : > { %v679_v7 = vadd.f32 %v678_v5, %v469_v51  ;;  %v680_v8 = vpop.f32.mrb[6].mxu0  ;;  %1135 = vmatprep.mubr.bf16.mxu1 %v694_v2  ;;  %1188 = vmatprep.mubr.bf16.mxu0 %v694_v2  ;;  %v2706_v2 = vld [vmem:[#allocation9 + $0x70] ss:$8 sps:$4 sm:$0xff]   ;;  %v2714_v5 = vld [vmem:[#allocation9 + $0x94] ss:$8 sps:$4 sm:$0xff]  }
 0x1b6   : > { %v689_v9 = vmax.f32 %v677_v4, 0.0  ;;  %v681_v10 = vadd.f32 %v680_v8, %v465_v50  ;;  %v682_v11 = vpop.f32.mrb[7].mxu0  ;;  %1136 = vmatmul.mubr.bf16.vlgmr.msra.gmra.mrb[0].mxu1 %v693_v0  ;;  %1189 = vmatmul.mubr.bf16.vlgmr.msra.gmra.mrb[8].mxu0 %v693_v0  ;;  %v2639_v50 = vld [vmem:[#allocation7 + $0x104] ss:$8 sps:$4 sm:$0xff]   ;;  %v2703_v0 = vld [vmem:[#allocation9 + $0x60] ss:$8 sps:$4 sm:$0xff]  }
 0x1b7   : > { %v690_v12 = vmax.f32 %v679_v7, 0.0  ;;  %v683_v13 = vadd.f32 %v682_v11, %v469_v51  ;;  %1630 = vmatpush1.bf16.msra.mxu1 %v2589_v3  ;;  %v2685_v51 = vld [vmem:[#allocation9] ss:$8 sps:$4 sm:$0xff]   ;;  %v2711_v3 = vld [vmem:[#allocation9 + $0x84] ss:$8 sps:$4 sm:$0xff]   ;;  %v773_v8 = vsub.s32 2, %v3213_v46 }
 0x1b8   : > { %v691_v15 = vmax.f32 %v681_v10, 0.0  ;;  %1631 = vmatprep.subr.bf16.mxu1 %v2594_v6  ;;  %1952 = vmatpush1.bf16.msra.mxu0 %v2685_v51  ;;  %v2709_v4 = vld [vmem:[#allocation9 + $0x80] ss:$8 sps:$4 sm:$0xff]   ;;  %v2712_v6 = vld [vmem:[#allocation9 + $0x90] ss:$8 sps:$4 sm:$0xff]   ;;  %v777_v10 = vsub.s32 3, %v3213_v46 }
 0x1b9   : > { %v692_v17 = vmax.f32 %v683_v13, 0.0  ;;  %1953 = vmatprep.subr.bf16.mxu0 %v2690_v53  ;;  %v2717_v7 = vld [vmem:[#allocation9 + $0xa4] ss:$8 sps:$4 sm:$0xff]   ;;  %v2715_v11 = vld [vmem:[#allocation9 + $0xa0] ss:$8 sps:$4 sm:$0xff]  }
 0x1ba   : > { %v695_v18 = vpack.c.bf16 %v691_v15, %v689_v9  ;;  %v761_v9 = vld [vmem:[%s3283_s4] sm:$0xf] }
 0x1bb   : > { %v696_v19 = vpack.c.bf16 %v692_v17, %v690_v12  ;;  %1632 = vmatpush1.bf16.msra.mxu1 %v2592_v14  ;;  %v2720_v12 = vld [vmem:[#allocation9 + $0xb4] ss:$8 sps:$4 sm:$0xff]   ;;  %v766_v13 = vrot.slane %v761_v9, %v3216_v47  ;;  %v774_v14 = vrot.slane %v761_v9, %v773_v8  ;;  %v3233_v15 = vrot.slane %v761_v9, %v3222_v49  ;;  %v2718_v17 = vld [vmem:[#allocation9 + $0xb0] ss:$8 sps:$4 sm:$0xff]   ;;  %v2637_v53 = vld [vmem:[#allocation7 + $0x100] ss:$8 sps:$4 sm:$0xff]  }
 0x1bc   : > { %1633 = vmatprep.subr.bf16.mxu1 %v2597_v16  ;;  %1954 = vmatpush1.bf16.msra.mxu0 %v2688_v54  ;;  %v3235_v16 = vrot.slane %v761_v9, %v777_v10  ;;  %v2640_v8 = vld [vmem:[#allocation7 + $0x110] ss:$8 sps:$4 sm:$0xff]  }
 0x1bd   : > { %1145 = vmatprep.mubr.bf16.mxu1 %v696_v19  ;;  %1198 = vmatprep.mubr.bf16.mxu0 %v696_v19 }
 0x1be   : > { %1146 = vmatmul.mubr.bf16.gmra.mrb[4].mxu1 %v695_v18  ;;  %1199 = vmatmul.mubr.bf16.gmra.mrb[12].mxu0 %v695_v18  ;;  %v2723_v18 = vld [vmem:[#allocation9 + $0xc4] ss:$8 sps:$4 sm:$0xff]  }
 0x1bf   : > { %1634 = vmatpush1.bf16.msra.mxu1 %v2595_v20  ;;  %1955 = vmatprep.subr.bf16.mxu0 %v2693_v55 }
 0x1c0   : > { %1635 = vmatprep.subr.bf16.mxu1 %v2600_v21  ;;  %1956 = vmatpush1.bf16.msra.mxu0 %v2691_v56 }
 0x1c1   : > { %1957 = vmatprep.subr.bf16.mxu0 %v2696_v57  ;;  %v2642_v57 = vld [vmem:[#allocation7 + $0x114] ss:$8 sps:$4 sm:$0xff]  }
 0x1c3   : > { %1636 = vmatpush1.bf16.msra.mxu1 %v2598_v22 }
 0x1c4   : > { %1637 = vmatprep.subr.bf16.mxu1 %v2603_v23  ;;  %1958 = vmatpush1.bf16.msra.mxu0 %v2694_v58 }
 0x1c5   : > { %1959 = vmatprep.subr.bf16.mxu0 %v2699_v59 }
 0x1c7   : > { %1638 = vmatpush1.bf16.msra.mxu1 %v2601_v24 }
 0x1c8   : > { %1639 = vmatprep.subr.bf16.mxu1 %v2606_v25  ;;  %1960 = vmatpush1.bf16.msra.mxu0 %v2697_v60 }
 0x1c9   : > { %1961 = vmatprep.subr.bf16.mxu0 %v2702_v61 }
 0x1cb   : > { %1640 = vmatpush1.bf16.msra.mxu1 %v2604_v26 }
 0x1cc   : > { %1641 = vmatprep.subr.bf16.mxu1 %v2609_v27  ;;  %1962 = vmatpush1.bf16.msra.mxu0 %v2700_v62 }
 0x1cd   : > { %1963 = vmatprep.subr.bf16.mxu0 %v2705_v63 }
 0x1cf   : > { %1642 = vmatpush1.bf16.msra.mxu1 %v2607_v28  ;;  %v2721_v28 = vld [vmem:[#allocation9 + $0xc0] ss:$8 sps:$4 sm:$0xff]  }
 0x1d0   : > { %1643 = vmatprep.subr.bf16.mxu1 %v2612_v29  ;;  %1964 = vmatpush1.bf16.msra.mxu0 %v2703_v0 }
 0x1d1   : > { %1965 = vmatprep.subr.bf16.mxu0 %v2708_v1 }
 0x1d3   : > { %1644 = vmatpush1.bf16.msra.mxu1 %v2610_v30 }
 0x1d4   : > { %1645 = vmatprep.subr.bf16.mxu1 %v2615_v31  ;;  %1966 = vmatpush1.bf16.msra.mxu0 %v2706_v2 }
 0x1d5   : > { %1967 = vmatprep.subr.bf16.mxu0 %v2711_v3 }
 0x1d7   : > { %1646 = vmatpush1.bf16.msra.mxu1 %v2613_v32 }
 0x1d8   : > { %1647 = vmatprep.subr.bf16.mxu1 %v2618_v33  ;;  %1968 = vmatpush1.bf16.msra.mxu0 %v2709_v4  ;;  %v2726_v33 = vld [vmem:[#allocation9 + $0xd4] ss:$8 sps:$4 sm:$0xff]  }
 0x1d9   : > { %1969 = vmatprep.subr.bf16.mxu0 %v2714_v5 }
 0x1db   : > { %1648 = vmatpush1.bf16.msra.mxu1 %v2616_v34 }
 0x1dc   : > { %1649 = vmatprep.subr.bf16.mxu1 %v2621_v35  ;;  %1970 = vmatpush1.bf16.msra.mxu0 %v2712_v6 }
 0x1dd   : > { %1971 = vmatprep.subr.bf16.mxu0 %v2717_v7 }
 0x1df   : > { %1650 = vmatpush1.bf16.msra.mxu1 %v2619_v36 }
 0x1e0   : > { %1651 = vmatprep.subr.bf16.mxu1 %v2624_v37  ;;  %1972 = vmatpush1.bf16.msra.mxu0 %v2715_v11 }
 0x1e1   : > { %1973 = vmatprep.subr.bf16.mxu0 %v2720_v12  ;;  %v2645_v12 = vld [vmem:[#allocation7 + $0x124] ss:$8 sps:$4 sm:$0xff]  }
 0x1e3   : > { %1652 = vmatpush1.bf16.msra.mxu1 %v2622_v38 }
 0x1e4   : > { %1653 = vmatprep.subr.bf16.mxu1 %v2627_v39  ;;  %1974 = vmatpush1.bf16.msra.mxu0 %v2718_v17 }
 0x1e5   : > { %1975 = vmatprep.subr.bf16.mxu0 %v2723_v18 }
 0x1e7   : > { %1654 = vmatpush1.bf16.msra.mxu1 %v2625_v40 }
 0x1e8   : > { %1655 = vmatprep.subr.bf16.mxu1 %v2630_v41  ;;  %1976 = vmatpush1.bf16.msra.mxu0 %v2721_v28  ;;  %v2660_v28 = vld [vmem:[#allocation7 + $0x174] ss:$8 sps:$4 sm:$0xff]  }
 0x1e9   : > { %1977 = vmatprep.subr.bf16.mxu0 %v2726_v33  ;;  %v2664_v33 = vld [vmem:[#allocation7 + $0x190] ss:$8 sps:$4 sm:$0xff]  }
 0x1eb   : > { %1656 = vmatpush1.bf16.msra.mxu1 %v2628_v42 }
 0x1ec   : > { %1657 = vmatprep.subr.bf16.mxu1 %v2633_v43 }
 0x1ef   : > { %1658 = vmatpush1.bf16.msra.mxu1 %v2631_v44  ;;  %v2724_v44 = vld [vmem:[#allocation9 + $0xd0] ss:$8 sps:$4 sm:$0xff]  }
 0x1f0   : > { %1659 = vmatprep.subr.bf16.mxu1 %v2636_v45  ;;  %1978 = vmatpush1.bf16.msra.mxu0 %v2724_v44  ;;  %v2684_v44 = vld [vmem:[#allocation7 + $0x1f4] ss:$8 sps:$4 sm:$0xff]  }
 0x1f3   : > { %1660 = vmatpush1.bf16.msra.mxu1 %v2634_v48 }
 0x1f4   : > { %1682 = vmatprep.subr.bf16.mxu1 %v2639_v50 }
 0x289   : > { %v1137_v19 = vpop.f32.mrb[0].mxu1  ;;  %v1190_v20 = vpop.f32.mrb[8].mxu0 }
 0x28a   : > { %v1138_v21 = vadd.f32 %v1137_v19, %v766_v13  ;;  %v1191_v46 = vadd.f32 %v1190_v20, %v774_v14  ;;  %v1139_v22 = vpop.f32.mrb[1].mxu1  ;;  %v1192_v23 = vpop.f32.mrb[9].mxu0 }
 0x28b   : > { %v1140_v24 = vadd.f32 %v1139_v22, %v3233_v15  ;;  %v1193_v25 = vadd.f32 %v1192_v23, %v3235_v16  ;;  %v1141_v26 = vpop.f32.mrb[2].mxu1  ;;  %v1194_v27 = vpop.f32.mrb[10].mxu0  ;;  %v2651_v22 = vld [vmem:[#allocation7 + $0x144] ss:$8 sps:$4 sm:$0xff]   ;;  %v2649_v23 = vld [vmem:[#allocation7 + $0x140] ss:$8 sps:$4 sm:$0xff]  }
 0x28c   : > { %v1142_v29 = vadd.f32 %v1141_v26, %v766_v13  ;;  %v1195_v30 = vadd.f32 %v1194_v27, %v774_v14  ;;  %v1143_v31 = vpop.f32.mrb[3].mxu1  ;;  %v1196_v32 = vpop.f32.mrb[11].mxu0  ;;  %v1209_v36 = vmax.f32 %v1138_v21, 0.0  ;;  %v1211_v37 = vmax.f32 %v1191_v46, 0.0  ;;  %v2657_v26 = vld [vmem:[#allocation7 + $0x164] ss:$8 sps:$4 sm:$0xff]  }
 0x28d   : > { %v1144_v34 = vadd.f32 %v1143_v31, %v3233_v15  ;;  %v1197_v35 = vadd.f32 %v1196_v32, %v3235_v16  ;;  %v1210_v40 = vmax.f32 %v1140_v24, 0.0  ;;  %v1212_v41 = vmax.f32 %v1193_v25, 0.0  ;;  %v2654_v24 = vld [vmem:[#allocation7 + $0x154] ss:$8 sps:$4 sm:$0xff]   ;;  %v2652_v25 = vld [vmem:[#allocation7 + $0x150] ss:$8 sps:$4 sm:$0xff]  }
 0x28e   : > { %v1213_v38 = vmax.f32 %v1142_v29, 0.0  ;;  %v1215_v39 = vmax.f32 %v1195_v30, 0.0  ;;  %v2655_v27 = vld [vmem:[#allocation7 + $0x160] ss:$8 sps:$4 sm:$0xff]   ;;  %v2658_v29 = vld [vmem:[#allocation7 + $0x170] ss:$8 sps:$4 sm:$0xff]  }
 0x28f   : > { %v1214_v42 = vmax.f32 %v1144_v34, 0.0  ;;  %v1216_v43 = vmax.f32 %v1197_v35, 0.0  ;;  %v2663_v30 = vld [vmem:[#allocation7 + $0x184] ss:$8 sps:$4 sm:$0xff]   ;;  %v2661_v31 = vld [vmem:[#allocation7 + $0x180] ss:$8 sps:$4 sm:$0xff]  }
 0x290   : > { %v1225_v45 = vpack.c.bf16 %v1213_v38, %v1209_v36  ;;  %v3241_v48 = vpack.c.bf16 %v1215_v39, %v1211_v37  ;;  %v2666_v32 = vld [vmem:[#allocation7 + $0x194] ss:$8 sps:$4 sm:$0xff]   ;;  %v2669_v34 = vld [vmem:[#allocation7 + $0x1a4] ss:$8 sps:$4 sm:$0xff]   ;;  %v2667_v35 = vld [vmem:[#allocation7 + $0x1a0] ss:$8 sps:$4 sm:$0xff]  }
 0x291   : > { %v1226_v50 = vpack.c.bf16 %v1214_v42, %v1210_v40  ;;  %v1228_v51 = vpack.c.bf16 %v1216_v43, %v1212_v41  ;;  %v1147_v52 = vpop.f32.mrb[4].mxu1  ;;  %v1200_v54 = vpop.f32.mrb[12].mxu0  ;;  %v2672_v36 = vld [vmem:[#allocation7 + $0x1b4] ss:$8 sps:$4 sm:$0xff]   ;;  %v2670_v37 = vld [vmem:[#allocation7 + $0x1b0] ss:$8 sps:$4 sm:$0xff]  }
 0x292   : > { %v1148_v55 = vadd.f32 %v1147_v52, %v766_v13  ;;  %v1149_v56 = vpop.f32.mrb[5].mxu1  ;;  %v1201_v58 = vadd.f32 %v1200_v54, %v774_v14  ;;  %v1202_v59 = vpop.f32.mrb[13].mxu0  ;;  %v2675_v38 = vld [vmem:[#allocation7 + $0x1c4] ss:$8 sps:$4 sm:$0xff]   ;;  %v2673_v39 = vld [vmem:[#allocation7 + $0x1c0] ss:$8 sps:$4 sm:$0xff]  }
 0x293   : > { %v1150_v60 = vadd.f32 %v1149_v56, %v3233_v15  ;;  %v1151_v61 = vpop.f32.mrb[6].mxu1  ;;  %1661 = vmatprep.mubr.bf16.mxu1 %v1226_v50  ;;  %v1203_v62 = vadd.f32 %v1202_v59, %v3235_v16  ;;  %v1204_v63 = vpop.f32.mrb[14].mxu0  ;;  %v2678_v40 = vld [vmem:[#allocation7 + $0x1d4] ss:$8 sps:$4 sm:$0xff]   ;;  %v2676_v41 = vld [vmem:[#allocation7 + $0x1d0] ss:$8 sps:$4 sm:$0xff]  }
 0x294   : > { %v1217_v0 = vmax.f32 %v1148_v55, 0.0  ;;  %v1152_v1 = vadd.f32 %v1151_v61, %v766_v13  ;;  %v1153_v2 = vpop.f32.mrb[7].mxu1  ;;  %1662 = vmatmul.mubr.bf16.vlgmr.msra.gmra.mrb[8].mxu1 %v1225_v45  ;;  %v1219_v3 = vmax.f32 %v1201_v58, 0.0  ;;  %v1205_v4 = vadd.f32 %v1204_v63, %v774_v14  ;;  %v1206_v5 = vpop.f32.mrb[15].mxu0  ;;  %v2643_v14 = vld [vmem:[#allocation7 + $0x120] ss:$8 sps:$4 sm:$0xff]  }
 0x295   : > { %v1218_v6 = vmax.f32 %v1150_v60, 0.0  ;;  %v1154_v7 = vadd.f32 %v1153_v2, %v3233_v15  ;;  %1683 = vmatpush1.bf16.msra.mxu1 %v2637_v53  ;;  %v1220_v9 = vmax.f32 %v1203_v62, 0.0  ;;  %v1207_v10 = vadd.f32 %v1206_v5, %v3235_v16  ;;  %v2648_v15 = vld [vmem:[#allocation7 + $0x134] ss:$8 sps:$4 sm:$0xff]   ;;  %v2646_v16 = vld [vmem:[#allocation7 + $0x130] ss:$8 sps:$4 sm:$0xff]  }
 0x296   : > { %v1221_v11 = vmax.f32 %v1152_v1, 0.0  ;;  %1684 = vmatprep.subr.bf16.mxu1 %v2642_v57  ;;  %v1223_v17 = vmax.f32 %v1205_v4, 0.0  ;;  %v2681_v42 = vld [vmem:[#allocation7 + $0x1e4] ss:$8 sps:$4 sm:$0xff]   ;;  %v2679_v43 = vld [vmem:[#allocation7 + $0x1e0] ss:$8 sps:$4 sm:$0xff]  }
 0x297   : > { %v1222_v18 = vmax.f32 %v1154_v7, 0.0  ;;  %v1224_v19 = vmax.f32 %v1207_v10, 0.0  ;;  %v2682_v45 = vld [vmem:[#allocation7 + $0x1f0] ss:$8 sps:$4 sm:$0xff]   ;;  %v2729_v50 = vld [vmem:[#allocation9 + $0xe4] ss:$8 sps:$4 sm:$0xff]  }
 0x298   : > { %v1229_v13 = vpack.c.bf16 %v1221_v11, %v1217_v0  ;;  %v3247_v20 = vpack.c.bf16 %v1223_v17, %v1219_v3  ;;  %1979 = vmatprep.subr.bf16.mxu0 %v2729_v50  ;;  %v2732_v52 = vld [vmem:[#allocation9 + $0xf4] ss:$8 sps:$4 sm:$0xff]   ;;  %v2730_v53 = vld [vmem:[#allocation9 + $0xf0] ss:$8 sps:$4 sm:$0xff]   ;;  %v1297_v54 = vld [vmem:[%s3285_s6] sm:$0x3] }
 0x299   : > { %v1230_v21 = vpack.c.bf16 %v1222_v18, %v1218_v6  ;;  %1685 = vmatpush1.bf16.msra.mxu1 %v2640_v8  ;;  %v1232_v46 = vpack.c.bf16 %v1224_v19, %v1220_v9  ;;  %v1302_v55 = vrot.slane %v1297_v54, %v3216_v47  ;;  %v1306_v56 = vrot.slane %v1297_v54, %v3222_v49 }
 0x29a   : > { %1686 = vmatprep.subr.bf16.mxu1 %v2645_v12 }
 0x29b   : > { %1671 = vmatprep.mubr.bf16.mxu1 %v1230_v21 }
 0x29c   : > { %1672 = vmatmul.mubr.bf16.gmra.mrb[12].mxu1 %v1229_v13 }
 0x29d   : > { %1687 = vmatpush1.bf16.msra.mxu1 %v2643_v14  ;;  %1714 = vmatprep.mubr.bf16.mxu1 %v1228_v51  ;;  %v2727_v51 = vld [vmem:[#allocation9 + $0xe0] ss:$8 sps:$4 sm:$0xff]  }
 0x29e   : > { %1688 = vmatprep.subr.bf16.mxu1 %v2648_v15  ;;  %1980 = vmatpush1.bf16.msra.mxu0 %v2727_v51 }
 0x29f   : > { %1981 = vmatprep.subr.bf16.mxu0 %v2732_v52 }
 0x2a1   : > { %1689 = vmatpush1.bf16.msra.mxu1 %v2646_v16 }
 0x2a2   : > { %1690 = vmatprep.subr.bf16.mxu1 %v2651_v22  ;;  %1982 = vmatpush1.bf16.msra.mxu0 %v2730_v53 }
 0x2a5   : > { %1691 = vmatpush1.bf16.msra.mxu1 %v2649_v23 }
 0x2a6   : > { %1692 = vmatprep.subr.bf16.mxu1 %v2654_v24 }
 0x2a9   : > { %1693 = vmatpush1.bf16.msra.mxu1 %v2652_v25 }
 0x2aa   : > { %1694 = vmatprep.subr.bf16.mxu1 %v2657_v26 }
 0x2ad   : > { %1695 = vmatpush1.bf16.msra.mxu1 %v2655_v27 }
 0x2ae   : > { %1696 = vmatprep.subr.bf16.mxu1 %v2660_v28 }
 0x2b1   : > { %1697 = vmatpush1.bf16.msra.mxu1 %v2658_v29 }
 0x2b2   : > { %1698 = vmatprep.subr.bf16.mxu1 %v2663_v30 }
 0x2b5   : > { %1699 = vmatpush1.bf16.msra.mxu1 %v2661_v31 }
 0x2b6   : > { %1700 = vmatprep.subr.bf16.mxu1 %v2666_v32 }
 0x2b9   : > { %1701 = vmatpush1.bf16.msra.mxu1 %v2664_v33 }
 0x2ba   : > { %1702 = vmatprep.subr.bf16.mxu1 %v2669_v34 }
 0x2bd   : > { %1703 = vmatpush1.bf16.msra.mxu1 %v2667_v35 }
 0x2be   : > { %1704 = vmatprep.subr.bf16.mxu1 %v2672_v36 }
 0x2c1   : > { %1705 = vmatpush1.bf16.msra.mxu1 %v2670_v37 }
 0x2c2   : > { %1706 = vmatprep.subr.bf16.mxu1 %v2675_v38 }
 0x2c5   : > { %1707 = vmatpush1.bf16.msra.mxu1 %v2673_v39 }
 0x2c6   : > { %1708 = vmatprep.subr.bf16.mxu1 %v2678_v40 }
 0x2c9   : > { %1709 = vmatpush1.bf16.msra.mxu1 %v2676_v41 }
 0x2ca   : > { %1710 = vmatprep.subr.bf16.mxu1 %v2681_v42 }
 0x2cd   : > { %1711 = vmatpush1.bf16.msra.mxu1 %v2679_v43 }
 0x2ce   : > { %1712 = vmatprep.subr.bf16.mxu1 %v2684_v44 }
 0x2d1   : > { %1713 = vmatpush1.bf16.msra.mxu1 %v2682_v45 }
 0x2d4   : > { %1715 = vmatmul.mubr.bf16.vlgmr.msra.gmra.mrb[8].mxu1 %v3241_v48 }
 0x2d5   : > { %1724 = vmatprep.mubr.bf16.mxu1 %v1232_v46  ;;  %v1779_v46 = vld [vmem:[%s3287_s8] sm:$0x3] }
 0x2d6   : > { %v1784_v15 = vrot.slane %v1779_v46, %v3216_v47  ;;  %v1788_v16 = vrot.slane %v1779_v46, %v3222_v49 }
 0x2dc   : > { %1725 = vmatmul.mubr.bf16.gmra.mrb[12].mxu1 %v3247_v20 }
 0x3a7   : > { %v1716_v48 = vpop.f32.mrb[8].mxu1 }
 0x3a8   : > { %v2345_v57 = vadd.f32 %v1716_v48, %v1302_v55  ;;  %v1718_v58 = vpop.f32.mrb[9].mxu1 }
 0x3a9   : > { %v2346_v59 = vadd.f32 %v1718_v58, %v1306_v56  ;;  %v1720_v60 = vpop.f32.mrb[10].mxu1 }
 0x3aa   : > { %v2347_v61 = vadd.f32 %v1720_v60, %v1302_v55  ;;  %v1722_v62 = vpop.f32.mrb[11].mxu1  ;;  %v1735_v0 = vmax.f32 %v2345_v57, 0.0 }
 0x3ab   : > { %v2348_v63 = vadd.f32 %v1722_v62, %v1306_v56  ;;  %v1736_v2 = vmax.f32 %v2346_v59, 0.0 }
 0x3ac   : > { %v1737_v1 = vmax.f32 %v2347_v61, 0.0 }
 0x3ad   : > { %v1738_v3 = vmax.f32 %v2348_v63, 0.0 }
 0x3ae   : > { %v1743_v4 = vpack.c.bf16 %v1737_v1, %v1735_v0 }
 0x3af   : > { %v1744_v5 = vpack.c.bf16 %v1738_v3, %v1736_v2  ;;  %v1726_v6 = vpop.f32.mrb[12].mxu1 }
 0x3b0   : > { %v2349_v7 = vadd.f32 %v1726_v6, %v1302_v55  ;;  %v1728_v8 = vpop.f32.mrb[13].mxu1 }
 0x3b1   : > { %v2350_v9 = vadd.f32 %v1728_v8, %v1306_v56  ;;  %v1730_v10 = vpop.f32.mrb[14].mxu1  ;;  %1983 = vmatprep.mubr.bf16.mxu0 %v1744_v5 }
 0x3b2   : > { %v2351_v11 = vadd.f32 %v1730_v10, %v1302_v55  ;;  %v1732_v12 = vpop.f32.mrb[15].mxu1  ;;  %1984 = vmatmul.mubr.bf16.vlgmr.msra.gmra.mrb[16].mxu0 %v1743_v4  ;;  %v1739_v18 = vmax.f32 %v2349_v7, 0.0 }
 0x3b3   : > { %v2352_v17 = vadd.f32 %v1732_v12, %v1306_v56  ;;  %v1740_v13 = vmax.f32 %v2350_v9, 0.0 }
 0x3b4   : > { %v1741_v19 = vmax.f32 %v2351_v11, 0.0 }
 0x3b5   : > { %v1742_v20 = vmax.f32 %v2352_v17, 0.0 }
 0x3b6   : > { %v1745_v21 = vpack.c.bf16 %v1741_v19, %v1739_v18 }
 0x3b7   : > { %v1746_v14 = vpack.c.bf16 %v1742_v20, %v1740_v13 }
 0x3b9   : > { %1993 = vmatprep.mubr.bf16.mxu0 %v1746_v14 }
 0x3ba   : > { %1994 = vmatmul.mubr.bf16.gmra.mrb[20].mxu0 %v1745_v21 }
 0x485   : > { %v1985_v22 = vpop.f32.mrb[16].mxu0 }
 0x486   : > { %v1986_v23 = vadd.f32 %v1985_v22, %v1784_v15  ;;  %v1987_v24 = vpop.f32.mrb[17].mxu0 }
 0x487   : > { %v1988_v25 = vadd.f32 %v1987_v24, %v1788_v16  ;;  %v1989_v26 = vpop.f32.mrb[18].mxu0 }
 0x488   : > { %v2004_v27 = vmax.f32 %v1986_v23, 0.0  ;;  %v1990_v28 = vadd.f32 %v1989_v26, %v1784_v15  ;;  %v1991_v29 = vpop.f32.mrb[19].mxu0 }
 0x489   : > { %v2005_v30 = vmax.f32 %v1988_v25, 0.0  ;;  %v1992_v31 = vadd.f32 %v1991_v29, %v1788_v16 }
 0x48a   : > { %2012 = vst [vmem:[%s414_s20] sm:$0xff] %v2004_v27  ;;  %v2006_v32 = vmax.f32 %v1990_v28, 0.0 }
 0x48b   : > { %2013 = vst [vmem:[%s414_s20 + $0x8] sm:$0xff] %v2005_v30  ;;  %v2007_v47 = vmax.f32 %v1992_v31, 0.0 }
 0x48c   : > { %2014 = vst [vmem:[%s414_s20 + $0x10] sm:$0xff] %v2006_v32 }
 0x48d   : > { %2015 = vst [vmem:[%s414_s20 + $0x18] sm:$0xff] %v2007_v47  ;;  %v1995_v49 = vpop.f32.mrb[20].mxu0 }
 0x48e   : > { %v1996_v33 = vadd.f32 %v1995_v49, %v1784_v15  ;;  %v1997_v34 = vpop.f32.mrb[21].mxu0 }
 0x48f   : > { %v1998_v35 = vadd.f32 %v1997_v34, %v1788_v16  ;;  %v1999_v36 = vpop.f32.mrb[22].mxu0 }
 0x490   : > { %v2008_v37 = vmax.f32 %v1996_v33, 0.0  ;;  %v2000_v38 = vadd.f32 %v1999_v36, %v1784_v15  ;;  %v2001_v39 = vpop.f32.mrb[23].mxu0 }
 0x491   : > { %v2009_v40 = vmax.f32 %v1998_v35, 0.0  ;;  %v2002_v41 = vadd.f32 %v2001_v39, %v1788_v16 }
 0x492   : > { %2016 = vst [vmem:[%s414_s20 + $0x20] sm:$0xff] %v2008_v37  ;;  %v2010_v42 = vmax.f32 %v2000_v38, 0.0 }
 0x493   : > { %2017 = vst [vmem:[%s414_s20 + $0x28] sm:$0xff] %v2009_v40  ;;  %v2011_v43 = vmax.f32 %v2002_v41, 0.0 }
 0x494   : > { %2018 = vst [vmem:[%s414_s20 + $0x30] sm:$0xff] %v2010_v42 }
 0x495   : > { %2019 = vst [vmem:[%s414_s20 + $0x38] sm:$0xff] %v2011_v43 }
 0x496 PF: > { %s3310_s12 = smov %s3143_s30  ;;  %p21_p11 = scmp.ge.s32.totalorder %s3132_s29, 4  }
 0x497   : > { %s3311_s30 = smov %s2909_s10  ;;  %s3312_s10 = smov %s2913_s11 }
 0x498   : > { %s3313_s11 = smov %s3310_s12  ;;  %s3314_s12 = smov %s3132_s29 }
 0x499   :  { %23 = sbr.rel (!%p21_p11) target bundleno = 7 (0x7), region = 112 }
 0x4a0   :  { %2044 = vsyncpa [#allocation3], 1 }
 0x4a1   :  { %2046 = vsyncpa [#allocation3 + $0x1], 1 }
 0x4a2   :  { %2047 = vsyncpa [#allocation5], 1 }
 0x4a3   :  { %2048 = vsyncpa [#allocation8], 1 }

</bundles_post_ra>
